<compile_context>
chip_gen: v7x
topology: tpu7x:2x2x1
jax: 0.10.0
libtpu: 0.0.40
codegen_flags: <defaults>
</compile_context>

<pallas_src>
import functools
from math import log, pi

import numpy as np
import jax
import jax.numpy as jnp
from jax import lax
from jax.experimental import pallas as pl
from jax.experimental.pallas import tpu as pltpu
from jax.scipy.special import digamma, gammaln


def _round_up(x, m):
    return ((x + m - 1) // m) * m


# ----------------------------------------------------------------------------
# Fused Pallas kernel: all towers + per-row loss terms, one lane-dense slab.
# ----------------------------------------------------------------------------
def _fused_vae_kernel(x_ref, eps_ref, inv_sig_ref, *refs,
                      plan, nz, nw, nc, zscale, wscale, fuse_qy_qd,
                      raw_w, slab_w, compute_dtype):
    slab_ref = refs[-1]
    bias_ref = refs[-2]                    # (1, total) lane-aligned bias slab
    w_refs = refs[:-2]                     # weight matrices, one ref each

    def tower(h, t):
        layers = plan[t]
        nl = len(layers)
        for li, (wi, boff, width) in enumerate(layers):
            W = w_refs[wi][...]
            b = bias_ref[:, boff:boff + width]          # lane-aligned slice
            h = jnp.dot(h.astype(compute_dtype), W,
                        preferred_element_type=jnp.float32) + b
            if li + 1 < nl:
                h = jnp.maximum(h, 0.01 * h)            # LeakyReLU(0.01)
        return h

    x = x_ref[...]                                      # (tb, nx) f32

    # ---- Q(w, z | x) -------------------------------------------------------
    wz = tower(x, 0)                                    # (tb, 2*(nw+nz))
    mu_w = wz[:, :nw]
    mu_z = wz[:, nw:nw + nz]
    logvar_w = wz[:, nw + nz:2 * nw + nz]
    logvar_z = wz[:, 2 * nw + nz:]
    eps = eps_ref[...]                                  # (tb, nw+nz)
    w = mu_w + eps[:, :nw] * jnp.exp(0.5 * logvar_w)
    z = mu_z + eps[:, nw:] * jnp.exp(0.5 * logvar_z)
    wz_cat = jnp.concatenate([w, z], axis=-1)           # (tb, nw+nz)

    # ---- q(y | w, z) and Dirichlet logits -----------------------------------
    if fuse_qy_qd:
        qyd = tower(wz_cat, 1)                          # (tb, 2*nc) fused
        qy_logits = qyd[:, :nc]
        d_logits = qyd[:, nc:]
        t_px, t_pz = 2, 3
    else:
        qy_logits = tower(wz_cat, 1)                    # (tb, nc)
        d_logits = tower(wz_cat, 2)                     # (tb, nc)
        t_px, t_pz = 3, 4

    m = jnp.max(qy_logits, axis=-1, keepdims=True)
    e = jnp.exp(qy_logits - m)
    q = e * pl.reciprocal(jnp.sum(e, axis=-1, keepdims=True), approx=True)
    smooth = 1e-6
    q_y = smooth / nc + (1.0 - smooth) * q

    # ---- P(x | z), P(z | w, c) ----------------------------------------------
    rec = tower(z, t_px)                                # (tb, nx)
    zw = tower(w, t_pz)                                 # (tb, 2*nc*nz): [mu|lv]

    # ---- reconstruction NLL (constant part added on host) -------------------
    diff = (x - rec) * inv_sig_ref[...]
    loss_rec_row = 0.5 * jnp.sum(diff * diff, axis=-1, keepdims=True)

    # ---- KL(q(w|x) || N(0, I)) ----------------------------------------------
    kld_w = -0.5 * (1.0 + logvar_w - mu_w * mu_w - jnp.exp(logvar_w))
    loss_w_row = wscale * jnp.sum(kld_w, axis=-1, keepdims=True)

    # ---- q_y-weighted KL(q(z|x) || p(z|w,c)), vectorized over classes -------
    ncz = nc * nz
    mu2 = zw[:, :ncz]                                   # (tb, nc*nz)
    lv2 = zw[:, ncz:]                                   # (tb, nc*nz)
    muz_t = jnp.concatenate([mu_z] * nc, axis=-1)       # broadcast to nc*nz lanes
    lvz_t = jnp.concatenate([logvar_z] * nc, axis=-1)
    d = muz_t - mu2
    kld_e = 0.5 * (-1.0 + lv2 - lvz_t + jnp.exp(lvz_t - lv2)
                   + d * d * jnp.exp(-lv2))             # (tb, nc*nz)
    # per-class segment sum via one MXU dot against a 0/1 matrix
    r_idx = lax.broadcasted_iota(jnp.int32, (ncz, nc), 0)
    c_idx = lax.broadcasted_iota(jnp.int32, (ncz, nc), 1)
    seg = jnp.where((r_idx >= c_idx * nz) & (r_idx < (c_idx + 1) * nz),
                    1.0, 0.0)
    loss_z_c = jnp.dot(kld_e, seg, preferred_element_type=jnp.float32)  # (tb,nc)
    loss_z_row = zscale * jnp.sum(q_y * loss_z_c, axis=-1, keepdims=True)

    # ---- direct lane-dense slab stores (no in-VMEM concat chain) ------------
    off = 0

    def put(v):
        nonlocal off
        width = v.shape[1]
        slab_ref[:, off:off + width] = v
        off += width

    put(wz)
    put(wz_cat)
    put(q_y)
    put(d_logits)
    put(rec)
    put(zw)
    put(loss_rec_row)
    put(loss_z_row)
    put(loss_w_row)
    if slab_w > raw_w:
        slab_ref[:, raw_w:] = jnp.zeros((x.shape[0], slab_w - raw_w),
                                        jnp.float32)


def _fused_forward(x, eps, inv_sig, bias_slab, weights, *, plan, nz, nw, nc,
                   zscale, wscale, fuse_qy_qd, tile_b, compute_dtype):
    B_pad, nx = x.shape
    num_tiles = B_pad // tile_b
    raw_w = 2 * (nw + nz) + (nw + nz) + 2 * nc + nx + 2 * nc * nz + 3
    slab_w = _round_up(raw_w, 128)                       # lane-dense output slab

    def batch_spec(feat):
        return pl.BlockSpec((tile_b, feat), lambda b: (b, 0))

    def resident_spec(shape):                            # same block every step
        return pl.BlockSpec(shape, lambda b: (0, 0))

    in_specs = [batch_spec(nx), batch_spec(nw + nz), resident_spec(inv_sig.shape)]
    in_specs += [resident_spec(w.shape) for w in weights]
    in_specs += [resident_spec(bias_slab.shape)]

    kernel = functools.partial(
        _fused_vae_kernel, plan=plan, nz=nz, nw=nw, nc=nc,
        zscale=zscale, wscale=wscale, fuse_qy_qd=fuse_qy_qd,
        raw_w=raw_w, slab_w=slab_w, compute_dtype=compute_dtype)

    return pl.pallas_call(
        kernel,
        grid=(num_tiles,),
        out_shape=jax.ShapeDtypeStruct((B_pad, slab_w), jnp.float32),
        in_specs=in_specs,
        out_specs=pl.BlockSpec((tile_b, slab_w), lambda b: (b, 0)),
        compiler_params=pltpu.CompilerParams(
            dimension_semantics=("parallel",)),
    )(x, eps, inv_sig, *weights, bias_slab)


# ----------------------------------------------------------------------------
# Plain-JAX glue helpers
# ----------------------------------------------------------------------------
def softclip(t, lo, hi):
    r = lo + jax.nn.softplus(t - lo)
    return hi - jax.nn.softplus(hi - r)


def dirichlet_kl(alpha, beta):
    """KL(Dir(alpha) || Dir(beta)); alpha (B, C), beta (C,)."""
    a0 = jnp.sum(alpha, axis=-1)
    b0 = jnp.sum(beta, axis=-1)
    return (gammaln(a0) - jnp.sum(gammaln(alpha), axis=-1)
            - gammaln(b0) + jnp.sum(gammaln(beta), axis=-1)
            + jnp.sum((alpha - beta) * (digamma(alpha) - digamma(a0)[..., None]),
                      axis=-1))


def _build_tower(key, dims):
    """dims = [d_in] + numhidden*[nh] + [d_out].  Hidden layers are
    Linear -> BN(eval) -> Dropout(id) -> LeakyReLU with the BN affine folded
    into (W, b); final layer is plain Linear.  Returns list of (W, b) in f32.

    BN fold (eval): W' = W * gamma/sqrt(rv+eps); b' = (b-rm)*gamma/sqrt(rv+eps)+beta.
    Fresh-init defaults gamma=1, beta=0, rm=0, rv=1 are used here."""
    layers = []
    keys = jax.random.split(key, len(dims) - 1)
    bn_scale = 1.0 / float(np.sqrt(1.0 + 1e-5))
    for i in range(1, len(dims)):
        fan_in, fan_out = dims[i - 1], dims[i]
        W = jax.random.normal(keys[i - 1], (fan_in, fan_out), jnp.float32)
        W = W / (float(fan_in) ** 0.5)
        b = jnp.zeros((fan_out,), jnp.float32)
        if i < len(dims) - 1:
            W = W * bn_scale
            b = b * bn_scale
        layers.append((W, b))
    return layers


def _fuse_two_towers(t1, t2):
    """Fuse two same-depth towers with identical input into one block-diagonal
    tower (first layer hstacked, later layers block-diagonal)."""
    fused = []
    for li, ((W1, b1), (W2, b2)) in enumerate(zip(t1, t2)):
        if li == 0:
            W = jnp.concatenate([W1, W2], axis=1)
        else:
            top = jnp.concatenate(
                [W1, jnp.zeros((W1.shape[0], W2.shape[1]), W1.dtype)], axis=1)
            bot = jnp.concatenate(
                [jnp.zeros((W2.shape[0], W1.shape[1]), W2.dtype), W2], axis=1)
            W = jnp.concatenate([top, bot], axis=0)
        b = jnp.concatenate([b1, b2])
        fused.append((W, b))
    return fused


def _permute_pz_final(tower, nc, nz):
    """Permute Pz's final-layer columns from per-class [mu, logvar] blocks to
    [all mus (nc*nz) | all logvars (nc*nz)] so the kernel can compute the
    per-class KLD on one lane-dense block."""
    W, b = tower[-1]
    base = np.arange(nc)[:, None] * (2 * nz)
    mus = (base + np.arange(nz)[None, :]).reshape(-1)
    lvs = (base + nz + np.arange(nz)[None, :]).reshape(-1)
    perm = np.concatenate([mus, lvs])
    return tower[:-1] + [(W[:, perm], b[perm])]


def _mxu_is_256_wide():
    """True on v6e / v7x (256-wide MXU); False on v5e/v5p/v4 (128-wide)."""
    try:
        kind = jax.devices()[0].device_kind.lower()
    except Exception:
        return False
    return any(s in kind for s in ("v6", "v7", "7x"))


class VAEDirichlet1004:
    def __init__(self, nx=64, nh=128, nz=16, nw=8, nclasses=10,
                 dscale=1.0, wscale=1.0, yscale=1.0, zscale=1.0,
                 concentration=0.5, numhidden=2, seed=0,
                 use_bf16=True, max_tile_b=512, fuse_qy_qd="auto"):
        self.nx, self.nh, self.nz, self.nw = nx, nh, nz, nw
        self.nclasses = nclasses
        self.dscale, self.wscale = dscale, wscale
        self.yscale, self.zscale = yscale, zscale
        self.concentration = concentration
        self.numhidden = numhidden
        self.max_tile_b = max_tile_b
        # bf16 weights + bf16 matmul operands (f32 accumulation).  Deviates
        # from the f32 PyTorch reference at ~1e-2 rel on the loss; set
        # use_bf16=False for closer numerics.
        self.compute_dtype = jnp.bfloat16 if use_bf16 else jnp.float32
        if fuse_qy_qd == "auto":
            fuse_qy_qd = _mxu_is_256_wide()
        self.fuse_qy_qd = bool(fuse_qy_qd)

        key = jax.random.PRNGKey(seed)
        k_qwz, k_qy, k_qd, k_px, k_pz = jax.random.split(key, 5)
        hid = numhidden * [nh]
        t_qwz = _build_tower(k_qwz, [nx] + hid + [2 * (nw + nz)])
        t_qy = _build_tower(k_qy, [nw + nz] + hid + [nclasses])
        t_qd = _build_tower(k_qd, [nw + nz] + hid + [nclasses])
        t_px = _build_tower(k_px, [nz] + hid + [nx])
        t_pz = _build_tower(k_pz, [nw] + hid + [2 * nclasses * nz])
        t_pz = _permute_pz_final(t_pz, nclasses, nz)

        if self.fuse_qy_qd:
            towers = [t_qwz, _fuse_two_towers(t_qy, t_qd), t_px, t_pz]
        else:
            towers = [t_qwz, t_qy, t_qd, t_px, t_pz]

        # Pack: weights as individual resident arrays (bf16), all biases into
        # ONE lane-aligned (1, total) f32 slab with static offsets.
        weights, bias_chunks, plan = [], [], []
        boff = 0
        for tower in towers:
            lplan = []
            for (W, b) in tower:
                wi = len(weights)
                weights.append(jnp.asarray(W, self.compute_dtype))
                width = int(b.shape[0])
                bias_chunks.append(jnp.asarray(b, jnp.float32))
                pad = _round_up(width, 128) - width
                if pad:
                    bias_chunks.append(jnp.zeros((pad,), jnp.float32))
                lplan.append((wi, boff, width))
                boff += width + pad
            plan.append(tuple(lplan))
        self.plan = tuple(plan)
        self.weights = weights
        self.bias_slab = jnp.concatenate(bias_chunks)[None, :]

        self.logsigma_x = jnp.zeros((nx,), jnp.float32)
        self._forward_jit = jax.jit(self._forward_impl)

    def forward(self, x_img, key):
        return self._forward_jit(x_img, key)

    def _forward_impl(self, x_img, key):
        nx, nz, nw, nc = self.nx, self.nz, self.nw, self.nclasses
        smooth_eps = 1e-6

        B = x_img.shape[0]
        x = x_img.reshape(B, -1).astype(jnp.float32)        # nn.Flatten()
        assert x.shape[1] == nx

        key, keps, kd = jax.random.split(key, 3)
        eps = jax.random.normal(keps, (B, nw + nz), jnp.float32)

        # batch tile: multiple of 16 (bf16 sublane packing); keep grid >= 2
        # when possible so both v7x TensorCores get work.
        tile_b = min(self.max_tile_b, _round_up(B, 16))
        if _round_up(B, tile_b) == tile_b and tile_b >= 32:
            tile_b //= 2
        B_pad = _round_up(B, tile_b)
        if B_pad != B:
            padn = B_pad - B
            x_p = jnp.pad(x, ((0, padn), (0, 0)))
            eps_p = jnp.pad(eps, ((0, padn), (0, 0)))
        else:
            x_p, eps_p = x, eps

        logsigma_x = softclip(self.logsigma_x, -8.0, 8.0)
        inv_sig = jnp.exp(-logsigma_x)[None, :]              # hoisted constant

        slab = _fused_forward(
            x_p, eps_p, inv_sig, self.bias_slab, self.weights,
            plan=self.plan, nz=nz, nw=nw, nc=nc,
            zscale=self.zscale, wscale=self.wscale,
            fuse_qy_qd=self.fuse_qy_qd, tile_b=tile_b,
            compute_dtype=self.compute_dtype)
        slab = slab[:B]

        off = 0

        def take(width):
            nonlocal off
            seg = slab[:, off:off + width]
            off += width
            return seg

        wz_flat = take(2 * (nw + nz))
        wz_cat = take(nw + nz)
        q_y = take(nc)
        d_logits = take(nc)
        rec = take(nx)
        zw_flat = take(2 * nc * nz)
        loss_rec_row = take(1)
        loss_z_row = take(1)
        loss_w_row = take(1)

        w = wz_cat[:, :nw]
        z = wz_cat[:, nw:]
        wz = wz_flat.reshape(B, 2, nz + nw)
        mu_w, logvar_w = wz[:, 0, :nw], wz[:, 1, :nw]
        mu_z, logvar_z = wz[:, 0, nw:], wz[:, 1, nw:]
        mu_z_w = zw_flat[:, :nc * nz].reshape(B, nc, nz)
        logvar_z_w = zw_flat[:, nc * nz:].reshape(B, nc, nz)

        output = dict(wz=wz, mu_z=mu_z, mu_w=mu_w,
                      logvar_z=logvar_z, logvar_w=logvar_w, w=w, z=z,
                      q_y=q_y, d_logits=d_logits, rec=rec,
                      mu_z_w=mu_z_w, logvar_z_w=logvar_z_w)
        # TODO(synk): the torch.distributions objects (Pz, Py, D_y, Qy) in the
        # original output dict have no array equivalent; their parameters are
        # returned instead and sampling/KL is done below in plain JAX.

        loss_rec = (jnp.mean(loss_rec_row) + jnp.sum(logsigma_x)
                    + 0.5 * nx * log(2.0 * pi))
        loss_z = jnp.mean(loss_z_row)
        loss_w = jnp.mean(loss_w_row)

        # Dirichlet / categorical terms (plain JAX glue).  d_logits clipped
        # before exp to avoid inf -> NaN in gammaln/digamma.
        alpha = jnp.exp(jnp.clip(d_logits, -30.0, 30.0))
        p_y = jax.random.dirichlet(kd, alpha)                 # D_y.rsample()
        p_y = smooth_eps / nc + (1 - smooth_eps) * p_y
        lp_y = -log(float(nc))                                # uniform prior

        loss_y_alt = self.yscale * jnp.mean(
            jnp.sum(q_y * (jnp.log(q_y) - jnp.log(p_y)), axis=-1))
        loss_y_alt2 = jnp.float32(0.0)
        qym = jnp.mean(q_y, axis=0)
        loss_l = jnp.sum(qym * (jnp.log(qym) - lp_y))
        loss_l_alt = jnp.mean(jnp.sum(q_y * (jnp.log(q_y) - lp_y), axis=-1))
        loss_y = -jnp.mean(jnp.max(q_y, axis=-1))
        beta = jnp.full((nc,), self.concentration, jnp.float32)
        loss_d = self.dscale * jnp.mean(dirichlet_kl(alpha, beta))

        total = loss_rec + loss_z + loss_w + loss_d + loss_y_alt + loss_y_alt2
        num_clusters = jnp.sum(
            jnp.sum(jnp.where(q_y > 0.5, q_y, 0.0), axis=0) > 0)

        output["losses"] = dict(
            rec=loss_rec, loss_z=loss_z, loss_w=loss_w, loss_l=loss_l,
            loss_l_alt=loss_l_alt, loss_y=loss_y, loss_d=loss_d,
            loss_y_alt=loss_y_alt, loss_y_alt2=loss_y_alt2,
            total_loss=total, num_clusters=num_clusters)
        return output


if __name__ == "__main__":
    # small shapes consistent with the module: x is NCHW, flattened to nx=C*H*W
    B, C, H, W = 8, 1, 8, 8
    nx = C * H * W
    model = VAEDirichlet1004(nx=nx, nh=128, nz=16, nw=8, nclasses=10,
                             numhidden=2, seed=0)

    key = jax.random.PRNGKey(0)
    k_in, k_fwd = jax.random.split(key)
    x_img = jax.random.normal(k_in, (B, C, H, W), jnp.float32)

    out = model.forward(x_img, k_fwd)
    total = jax.block_until_ready(out["losses"]["total_loss"])
    _ = jax.block_until_ready(out["rec"])
    assert jnp.isfinite(total)
    print("KERNEL_OK")
</pallas_src>

<mosaic_0001>
module attributes {stable_mosaic.version = 11 : i64} {
  func.func @_fused_vae_kernel(%arg0: i32, %arg1: memref<16x64xf32, #tpu.memory_space<vmem>>, %arg2: memref<16x24xf32, #tpu.memory_space<vmem>>, %arg3: memref<1x64xf32, #tpu.memory_space<vmem>>, %arg4: memref<64x128xbf16, #tpu.memory_space<vmem>>, %arg5: memref<128x128xbf16, #tpu.memory_space<vmem>>, %arg6: memref<128x48xbf16, #tpu.memory_space<vmem>>, %arg7: memref<24x128xbf16, #tpu.memory_space<vmem>>, %arg8: memref<128x128xbf16, #tpu.memory_space<vmem>>, %arg9: memref<128x10xbf16, #tpu.memory_space<vmem>>, %arg10: memref<24x128xbf16, #tpu.memory_space<vmem>>, %arg11: memref<128x128xbf16, #tpu.memory_space<vmem>>, %arg12: memref<128x10xbf16, #tpu.memory_space<vmem>>, %arg13: memref<16x128xbf16, #tpu.memory_space<vmem>>, %arg14: memref<128x128xbf16, #tpu.memory_space<vmem>>, %arg15: memref<128x64xbf16, #tpu.memory_space<vmem>>, %arg16: memref<8x128xbf16, #tpu.memory_space<vmem>>, %arg17: memref<128x128xbf16, #tpu.memory_space<vmem>>, %arg18: memref<128x320xbf16, #tpu.memory_space<vmem>>, %arg19: memref<1x2176xf32, #tpu.memory_space<vmem>>, %arg20: memref<16x512xf32, #tpu.memory_space<vmem>>) attributes {dimension_semantics = [#tpu.dimension_semantics<parallel>], iteration_bounds = array<i64: 1>, scalar_prefetch = 0 : i64, scratch_operands = 0 : i64, tpu.core_type = #tpu.core_type<tc>, window_params = [{transform_indices = @transform_0, window_bounds = array<i64: 16, 64>}, {transform_indices = @transform_1, window_bounds = array<i64: 16, 24>}, {pipeline_mode = #tpu.pipeline_mode<synchronous>, transform_indices = @transform_2, window_bounds = array<i64: 1, 64>}, {pipeline_mode = #tpu.pipeline_mode<synchronous>, transform_indices = @transform_3, window_bounds = array<i64: 64, 128>}, {pipeline_mode = #tpu.pipeline_mode<synchronous>, transform_indices = @transform_4, window_bounds = array<i64: 128, 128>}, {pipeline_mode = #tpu.pipeline_mode<synchronous>, transform_indices = @transform_5, window_bounds = array<i64: 128, 48>}, {pipeline_mode = #tpu.pipeline_mode<synchronous>, transform_indices = @transform_6, window_bounds = array<i64: 24, 128>}, {pipeline_mode = #tpu.pipeline_mode<synchronous>, transform_indices = @transform_7, window_bounds = array<i64: 128, 128>}, {pipeline_mode = #tpu.pipeline_mode<synchronous>, transform_indices = @transform_8, window_bounds = array<i64: 128, 10>}, {pipeline_mode = #tpu.pipeline_mode<synchronous>, transform_indices = @transform_9, window_bounds = array<i64: 24, 128>}, {pipeline_mode = #tpu.pipeline_mode<synchronous>, transform_indices = @transform_10, window_bounds = array<i64: 128, 128>}, {pipeline_mode = #tpu.pipeline_mode<synchronous>, transform_indices = @transform_11, window_bounds = array<i64: 128, 10>}, {pipeline_mode = #tpu.pipeline_mode<synchronous>, transform_indices = @transform_12, window_bounds = array<i64: 16, 128>}, {pipeline_mode = #tpu.pipeline_mode<synchronous>, transform_indices = @transform_13, window_bounds = array<i64: 128, 128>}, {pipeline_mode = #tpu.pipeline_mode<synchronous>, transform_indices = @transform_14, window_bounds = array<i64: 128, 64>}, {pipeline_mode = #tpu.pipeline_mode<synchronous>, transform_indices = @transform_15, window_bounds = array<i64: 8, 128>}, {pipeline_mode = #tpu.pipeline_mode<synchronous>, transform_indices = @transform_16, window_bounds = array<i64: 128, 128>}, {pipeline_mode = #tpu.pipeline_mode<synchronous>, transform_indices = @transform_17, window_bounds = array<i64: 128, 320>}, {pipeline_mode = #tpu.pipeline_mode<synchronous>, transform_indices = @transform_18, window_bounds = array<i64: 1, 2176>}, {transform_indices = @transform_19, window_bounds = array<i64: 16, 512>}]} {
    %c0 = arith.constant 0 : index
    %c0_0 = arith.constant 0 : index
    %0 = vector.load %arg1[%c0, %c0_0] : memref<16x64xf32, #tpu.memory_space<vmem>>, vector<16x64xf32>
    %c0_1 = arith.constant 0 : index
    %c0_2 = arith.constant 0 : index
    %1 = vector.load %arg4[%c0_1, %c0_2] : memref<64x128xbf16, #tpu.memory_space<vmem>>, vector<64x128xbf16>
    %c0_3 = arith.constant 0 : index
    %c0_4 = arith.constant 0 : index
    %2 = vector.load %arg19[%c0_3, %c0_4] : memref<1x2176xf32, #tpu.memory_space<vmem>>, vector<1x128xf32>
    %3 = arith.truncf %0 : vector<16x64xf32> to vector<16x64xbf16>
    %cst = arith.constant dense<0.000000e+00> : vector<16x128xf32>
    %4 = tpu.matmul %3, %1, %cst {dimension_numbers = #tpu.dot_dimension_numbers<[1], [0], [0], [1], [0, 0, 1, 1], [], []>} : vector<16x64xbf16>, vector<64x128xbf16>, vector<16x128xf32> -> vector<16x128xf32>
    %5 = vector.broadcast %2 : vector<1x128xf32> to vector<16x128xf32>
    %6 = arith.addf %4, %5 : vector<16x128xf32>
    %cst_5 = arith.constant 0.00999999977 : f32
    %7 = vector.broadcast %cst_5 : f32 to vector<16x128xf32>
    %8 = arith.mulf %7, %6 : vector<16x128xf32>
    %9 = arith.maximumf %6, %8 : vector<16x128xf32>
    %c0_6 = arith.constant 0 : index
    %c0_7 = arith.constant 0 : index
    %10 = vector.load %arg5[%c0_6, %c0_7] : memref<128x128xbf16, #tpu.memory_space<vmem>>, vector<128x128xbf16>
    %c0_8 = arith.constant 0 : index
    %c128 = arith.constant 128 : index
    %11 = vector.load %arg19[%c0_8, %c128] : memref<1x2176xf32, #tpu.memory_space<vmem>>, vector<1x128xf32>
    %12 = arith.truncf %9 : vector<16x128xf32> to vector<16x128xbf16>
    %cst_9 = arith.constant dense<0.000000e+00> : vector<16x128xf32>
    %13 = tpu.matmul %12, %10, %cst_9 {dimension_numbers = #tpu.dot_dimension_numbers<[1], [0], [0], [1], [0, 0, 1, 1], [], []>} : vector<16x128xbf16>, vector<128x128xbf16>, vector<16x128xf32> -> vector<16x128xf32>
    %14 = vector.broadcast %11 : vector<1x128xf32> to vector<16x128xf32>
    %15 = arith.addf %13, %14 : vector<16x128xf32>
    %cst_10 = arith.constant 0.00999999977 : f32
    %16 = vector.broadcast %cst_10 : f32 to vector<16x128xf32>
    %17 = arith.mulf %16, %15 : vector<16x128xf32>
    %18 = arith.maximumf %15, %17 : vector<16x128xf32>
    %c0_11 = arith.constant 0 : index
    %c0_12 = arith.constant 0 : index
    %19 = vector.load %arg6[%c0_11, %c0_12] : memref<128x48xbf16, #tpu.memory_space<vmem>>, vector<128x48xbf16>
    %c0_13 = arith.constant 0 : index
    %c256 = arith.constant 256 : index
    %20 = vector.load %arg19[%c0_13, %c256] : memref<1x2176xf32, #tpu.memory_space<vmem>>, vector<1x48xf32>
    %21 = arith.truncf %18 : vector<16x128xf32> to vector<16x128xbf16>
    %cst_14 = arith.constant dense<0.000000e+00> : vector<16x48xf32>
    %22 = tpu.matmul %21, %19, %cst_14 {dimension_numbers = #tpu.dot_dimension_numbers<[1], [0], [0], [1], [0, 0, 1, 1], [], []>} : vector<16x128xbf16>, vector<128x48xbf16>, vector<16x48xf32> -> vector<16x48xf32>
    %23 = vector.broadcast %20 : vector<1x48xf32> to vector<16x48xf32>
    %24 = arith.addf %22, %23 : vector<16x48xf32>
    %25 = vector.extract_strided_slice %24 {offsets = [0, 0], sizes = [16, 8], strides = [1, 1]} : vector<16x48xf32> to vector<16x8xf32>
    %26 = vector.extract_strided_slice %24 {offsets = [0, 8], sizes = [16, 16], strides = [1, 1]} : vector<16x48xf32> to vector<16x16xf32>
    %27 = vector.extract_strided_slice %24 {offsets = [0, 24], sizes = [16, 8], strides = [1, 1]} : vector<16x48xf32> to vector<16x8xf32>
    %28 = vector.extract_strided_slice %24 {offsets = [0, 32], sizes = [16, 16], strides = [1, 1]} : vector<16x48xf32> to vector<16x16xf32>
    %c0_15 = arith.constant 0 : index
    %c0_16 = arith.constant 0 : index
    %29 = vector.load %arg2[%c0_15, %c0_16] : memref<16x24xf32, #tpu.memory_space<vmem>>, vector<16x24xf32>
    %30 = vector.extract_strided_slice %29 {offsets = [0, 0], sizes = [16, 8], strides = [1, 1]} : vector<16x24xf32> to vector<16x8xf32>
    %cst_17 = arith.constant 5.000000e-01 : f32
    %31 = vector.broadcast %cst_17 : f32 to vector<16x8xf32>
    %32 = arith.mulf %31, %27 : vector<16x8xf32>
    %33 = math.exp %32 : vector<16x8xf32>
    %34 = arith.mulf %30, %33 : vector<16x8xf32>
    %35 = arith.addf %25, %34 : vector<16x8xf32>
    %36 = vector.extract_strided_slice %29 {offsets = [0, 8], sizes = [16, 16], strides = [1, 1]} : vector<16x24xf32> to vector<16x16xf32>
    %cst_18 = arith.constant 5.000000e-01 : f32
    %37 = vector.broadcast %cst_18 : f32 to vector<16x16xf32>
    %38 = arith.mulf %37, %28 : vector<16x16xf32>
    %39 = math.exp %38 : vector<16x16xf32>
    %40 = arith.mulf %36, %39 : vector<16x16xf32>
    %41 = arith.addf %26, %40 : vector<16x16xf32>
    %42 = tpu.concatenate %35, %41 in 1 : vector<16x8xf32>, vector<16x16xf32> -> vector<16x24xf32>
    %c0_19 = arith.constant 0 : index
    %c0_20 = arith.constant 0 : index
    %43 = vector.load %arg7[%c0_19, %c0_20] : memref<24x128xbf16, #tpu.memory_space<vmem>>, vector<24x128xbf16>
    %c0_21 = arith.constant 0 : index
    %c384 = arith.constant 384 : index
    %44 = vector.load %arg19[%c0_21, %c384] : memref<1x2176xf32, #tpu.memory_space<vmem>>, vector<1x128xf32>
    %45 = arith.truncf %42 : vector<16x24xf32> to vector<16x24xbf16>
    %cst_22 = arith.constant dense<0.000000e+00> : vector<16x128xf32>
    %46 = tpu.matmul %45, %43, %cst_22 {dimension_numbers = #tpu.dot_dimension_numbers<[1], [0], [0], [1], [0, 0, 1, 1], [], []>} : vector<16x24xbf16>, vector<24x128xbf16>, vector<16x128xf32> -> vector<16x128xf32>
    %47 = vector.broadcast %44 : vector<1x128xf32> to vector<16x128xf32>
    %48 = arith.addf %46, %47 : vector<16x128xf32>
    %cst_23 = arith.constant 0.00999999977 : f32
    %49 = vector.broadcast %cst_23 : f32 to vector<16x128xf32>
    %50 = arith.mulf %49, %48 : vector<16x128xf32>
    %51 = arith.maximumf %48, %50 : vector<16x128xf32>
    %c0_24 = arith.constant 0 : index
    %c0_25 = arith.constant 0 : index
    %52 = vector.load %arg8[%c0_24, %c0_25] : memref<128x128xbf16, #tpu.memory_space<vmem>>, vector<128x128xbf16>
    %c0_26 = arith.constant 0 : index
    %c512 = arith.constant 512 : index
    %53 = vector.load %arg19[%c0_26, %c512] : memref<1x2176xf32, #tpu.memory_space<vmem>>, vector<1x128xf32>
    %54 = arith.truncf %51 : vector<16x128xf32> to vector<16x128xbf16>
    %cst_27 = arith.constant dense<0.000000e+00> : vector<16x128xf32>
    %55 = tpu.matmul %54, %52, %cst_27 {dimension_numbers = #tpu.dot_dimension_numbers<[1], [0], [0], [1], [0, 0, 1, 1], [], []>} : vector<16x128xbf16>, vector<128x128xbf16>, vector<16x128xf32> -> vector<16x128xf32>
    %56 = vector.broadcast %53 : vector<1x128xf32> to vector<16x128xf32>
    %57 = arith.addf %55, %56 : vector<16x128xf32>
    %cst_28 = arith.constant 0.00999999977 : f32
    %58 = vector.broadcast %cst_28 : f32 to vector<16x128xf32>
    %59 = arith.mulf %58, %57 : vector<16x128xf32>
    %60 = arith.maximumf %57, %59 : vector<16x128xf32>
    %c0_29 = arith.constant 0 : index
    %c0_30 = arith.constant 0 : index
    %61 = vector.load %arg9[%c0_29, %c0_30] : memref<128x10xbf16, #tpu.memory_space<vmem>>, vector<128x10xbf16>
    %c0_31 = arith.constant 0 : index
    %c640 = arith.constant 640 : index
    %62 = vector.load %arg19[%c0_31, %c640] : memref<1x2176xf32, #tpu.memory_space<vmem>>, vector<1x10xf32>
    %63 = arith.truncf %60 : vector<16x128xf32> to vector<16x128xbf16>
    %cst_32 = arith.constant dense<0.000000e+00> : vector<16x10xf32>
    %64 = tpu.matmul %63, %61, %cst_32 {dimension_numbers = #tpu.dot_dimension_numbers<[1], [0], [0], [1], [0, 0, 1, 1], [], []>} : vector<16x128xbf16>, vector<128x10xbf16>, vector<16x10xf32> -> vector<16x10xf32>
    %65 = vector.broadcast %62 : vector<1x10xf32> to vector<16x10xf32>
    %66 = arith.addf %64, %65 : vector<16x10xf32>
    %c0_33 = arith.constant 0 : index
    %c0_34 = arith.constant 0 : index
    %67 = vector.load %arg10[%c0_33, %c0_34] : memref<24x128xbf16, #tpu.memory_space<vmem>>, vector<24x128xbf16>
    %c0_35 = arith.constant 0 : index
    %c768 = arith.constant 768 : index
    %68 = vector.load %arg19[%c0_35, %c768] : memref<1x2176xf32, #tpu.memory_space<vmem>>, vector<1x128xf32>
    %69 = arith.truncf %42 : vector<16x24xf32> to vector<16x24xbf16>
    %cst_36 = arith.constant dense<0.000000e+00> : vector<16x128xf32>
    %70 = tpu.matmul %69, %67, %cst_36 {dimension_numbers = #tpu.dot_dimension_numbers<[1], [0], [0], [1], [0, 0, 1, 1], [], []>} : vector<16x24xbf16>, vector<24x128xbf16>, vector<16x128xf32> -> vector<16x128xf32>
    %71 = vector.broadcast %68 : vector<1x128xf32> to vector<16x128xf32>
    %72 = arith.addf %70, %71 : vector<16x128xf32>
    %cst_37 = arith.constant 0.00999999977 : f32
    %73 = vector.broadcast %cst_37 : f32 to vector<16x128xf32>
    %74 = arith.mulf %73, %72 : vector<16x128xf32>
    %75 = arith.maximumf %72, %74 : vector<16x128xf32>
    %c0_38 = arith.constant 0 : index
    %c0_39 = arith.constant 0 : index
    %76 = vector.load %arg11[%c0_38, %c0_39] : memref<128x128xbf16, #tpu.memory_space<vmem>>, vector<128x128xbf16>
    %c0_40 = arith.constant 0 : index
    %c896 = arith.constant 896 : index
    %77 = vector.load %arg19[%c0_40, %c896] : memref<1x2176xf32, #tpu.memory_space<vmem>>, vector<1x128xf32>
    %78 = arith.truncf %75 : vector<16x128xf32> to vector<16x128xbf16>
    %cst_41 = arith.constant dense<0.000000e+00> : vector<16x128xf32>
    %79 = tpu.matmul %78, %76, %cst_41 {dimension_numbers = #tpu.dot_dimension_numbers<[1], [0], [0], [1], [0, 0, 1, 1], [], []>} : vector<16x128xbf16>, vector<128x128xbf16>, vector<16x128xf32> -> vector<16x128xf32>
    %80 = vector.broadcast %77 : vector<1x128xf32> to vector<16x128xf32>
    %81 = arith.addf %79, %80 : vector<16x128xf32>
    %cst_42 = arith.constant 0.00999999977 : f32
    %82 = vector.broadcast %cst_42 : f32 to vector<16x128xf32>
    %83 = arith.mulf %82, %81 : vector<16x128xf32>
    %84 = arith.maximumf %81, %83 : vector<16x128xf32>
    %c0_43 = arith.constant 0 : index
    %c0_44 = arith.constant 0 : index
    %85 = vector.load %arg12[%c0_43, %c0_44] : memref<128x10xbf16, #tpu.memory_space<vmem>>, vector<128x10xbf16>
    %c0_45 = arith.constant 0 : index
    %c1024 = arith.constant 1024 : index
    %86 = vector.load %arg19[%c0_45, %c1024] : memref<1x2176xf32, #tpu.memory_space<vmem>>, vector<1x10xf32>
    %87 = arith.truncf %84 : vector<16x128xf32> to vector<16x128xbf16>
    %cst_46 = arith.constant dense<0.000000e+00> : vector<16x10xf32>
    %88 = tpu.matmul %87, %85, %cst_46 {dimension_numbers = #tpu.dot_dimension_numbers<[1], [0], [0], [1], [0, 0, 1, 1], [], []>} : vector<16x128xbf16>, vector<128x10xbf16>, vector<16x10xf32> -> vector<16x10xf32>
    %89 = vector.broadcast %86 : vector<1x10xf32> to vector<16x10xf32>
    %90 = arith.addf %88, %89 : vector<16x10xf32>
    %cst_47 = arith.constant dense<0xFF800000> : vector<16xf32>
    %91 = vector.multi_reduction <maximumf>, %66, %cst_47 [1] : vector<16x10xf32> to vector<16xf32>
    %92 = vector.shape_cast %91 : vector<16xf32> to vector<16x1xf32>
    %93 = vector.broadcast %92 : vector<16x1xf32> to vector<16x10xf32>
    %94 = arith.subf %66, %93 : vector<16x10xf32>
    %95 = math.exp %94 : vector<16x10xf32>
    %cst_48 = arith.constant dense<0.000000e+00> : vector<16xf32>
    %96 = vector.multi_reduction <add>, %95, %cst_48 [1] : vector<16x10xf32> to vector<16xf32>
    %97 = vector.shape_cast %96 : vector<16xf32> to vector<16x1xf32>
    %98 = tpu.reciprocal %97 {approx = true} : vector<16x1xf32> -> vector<16x1xf32>
    %99 = vector.broadcast %98 : vector<16x1xf32> to vector<16x10xf32>
    %100 = arith.mulf %95, %99 : vector<16x10xf32>
    %cst_49 = arith.constant 0.999998986 : f32
    %101 = vector.broadcast %cst_49 : f32 to vector<16x10xf32>
    %102 = arith.mulf %101, %100 : vector<16x10xf32>
    %cst_50 = arith.constant 1.000000e-07 : f32
    %103 = vector.broadcast %cst_50 : f32 to vector<16x10xf32>
    %104 = arith.addf %103, %102 : vector<16x10xf32>
    %c0_51 = arith.constant 0 : index
    %c0_52 = arith.constant 0 : index
    %105 = vector.load %arg13[%c0_51, %c0_52] : memref<16x128xbf16, #tpu.memory_space<vmem>>, vector<16x128xbf16>
    %c0_53 = arith.constant 0 : index
    %c1152 = arith.constant 1152 : index
    %106 = vector.load %arg19[%c0_53, %c1152] : memref<1x2176xf32, #tpu.memory_space<vmem>>, vector<1x128xf32>
    %107 = arith.truncf %41 : vector<16x16xf32> to vector<16x16xbf16>
    %cst_54 = arith.constant dense<0.000000e+00> : vector<16x128xf32>
    %108 = tpu.matmul %107, %105, %cst_54 {dimension_numbers = #tpu.dot_dimension_numbers<[1], [0], [0], [1], [0, 0, 1, 1], [], []>} : vector<16x16xbf16>, vector<16x128xbf16>, vector<16x128xf32> -> vector<16x128xf32>
    %109 = vector.broadcast %106 : vector<1x128xf32> to vector<16x128xf32>
    %110 = arith.addf %108, %109 : vector<16x128xf32>
    %cst_55 = arith.constant 0.00999999977 : f32
    %111 = vector.broadcast %cst_55 : f32 to vector<16x128xf32>
    %112 = arith.mulf %111, %110 : vector<16x128xf32>
    %113 = arith.maximumf %110, %112 : vector<16x128xf32>
    %c0_56 = arith.constant 0 : index
    %c0_57 = arith.constant 0 : index
    %114 = vector.load %arg14[%c0_56, %c0_57] : memref<128x128xbf16, #tpu.memory_space<vmem>>, vector<128x128xbf16>
    %c0_58 = arith.constant 0 : index
    %c1280 = arith.constant 1280 : index
    %115 = vector.load %arg19[%c0_58, %c1280] : memref<1x2176xf32, #tpu.memory_space<vmem>>, vector<1x128xf32>
    %116 = arith.truncf %113 : vector<16x128xf32> to vector<16x128xbf16>
    %cst_59 = arith.constant dense<0.000000e+00> : vector<16x128xf32>
    %117 = tpu.matmul %116, %114, %cst_59 {dimension_numbers = #tpu.dot_dimension_numbers<[1], [0], [0], [1], [0, 0, 1, 1], [], []>} : vector<16x128xbf16>, vector<128x128xbf16>, vector<16x128xf32> -> vector<16x128xf32>
    %118 = vector.broadcast %115 : vector<1x128xf32> to vector<16x128xf32>
    %119 = arith.addf %117, %118 : vector<16x128xf32>
    %cst_60 = arith.constant 0.00999999977 : f32
    %120 = vector.broadcast %cst_60 : f32 to vector<16x128xf32>
    %121 = arith.mulf %120, %119 : vector<16x128xf32>
    %122 = arith.maximumf %119, %121 : vector<16x128xf32>
    %c0_61 = arith.constant 0 : index
    %c0_62 = arith.constant 0 : index
    %123 = vector.load %arg15[%c0_61, %c0_62] : memref<128x64xbf16, #tpu.memory_space<vmem>>, vector<128x64xbf16>
    %c0_63 = arith.constant 0 : index
    %c1408 = arith.constant 1408 : index
    %124 = vector.load %arg19[%c0_63, %c1408] : memref<1x2176xf32, #tpu.memory_space<vmem>>, vector<1x64xf32>
    %125 = arith.truncf %122 : vector<16x128xf32> to vector<16x128xbf16>
    %cst_64 = arith.constant dense<0.000000e+00> : vector<16x64xf32>
    %126 = tpu.matmul %125, %123, %cst_64 {dimension_numbers = #tpu.dot_dimension_numbers<[1], [0], [0], [1], [0, 0, 1, 1], [], []>} : vector<16x128xbf16>, vector<128x64xbf16>, vector<16x64xf32> -> vector<16x64xf32>
    %127 = vector.broadcast %124 : vector<1x64xf32> to vector<16x64xf32>
    %128 = arith.addf %126, %127 : vector<16x64xf32>
    %c0_65 = arith.constant 0 : index
    %c0_66 = arith.constant 0 : index
    %129 = vector.load %arg16[%c0_65, %c0_66] : memref<8x128xbf16, #tpu.memory_space<vmem>>, vector<8x128xbf16>
    %c0_67 = arith.constant 0 : index
    %c1536 = arith.constant 1536 : index
    %130 = vector.load %arg19[%c0_67, %c1536] : memref<1x2176xf32, #tpu.memory_space<vmem>>, vector<1x128xf32>
    %131 = arith.truncf %35 : vector<16x8xf32> to vector<16x8xbf16>
    %cst_68 = arith.constant dense<0.000000e+00> : vector<16x128xf32>
    %132 = tpu.matmul %131, %129, %cst_68 {dimension_numbers = #tpu.dot_dimension_numbers<[1], [0], [0], [1], [0, 0, 1, 1], [], []>} : vector<16x8xbf16>, vector<8x128xbf16>, vector<16x128xf32> -> vector<16x128xf32>
    %133 = vector.broadcast %130 : vector<1x128xf32> to vector<16x128xf32>
    %134 = arith.addf %132, %133 : vector<16x128xf32>
    %cst_69 = arith.constant 0.00999999977 : f32
    %135 = vector.broadcast %cst_69 : f32 to vector<16x128xf32>
    %136 = arith.mulf %135, %134 : vector<16x128xf32>
    %137 = arith.maximumf %134, %136 : vector<16x128xf32>
    %c0_70 = arith.constant 0 : index
    %c0_71 = arith.constant 0 : index
    %138 = vector.load %arg17[%c0_70, %c0_71] : memref<128x128xbf16, #tpu.memory_space<vmem>>, vector<128x128xbf16>
    %c0_72 = arith.constant 0 : index
    %c1664 = arith.constant 1664 : index
    %139 = vector.load %arg19[%c0_72, %c1664] : memref<1x2176xf32, #tpu.memory_space<vmem>>, vector<1x128xf32>
    %140 = arith.truncf %137 : vector<16x128xf32> to vector<16x128xbf16>
    %cst_73 = arith.constant dense<0.000000e+00> : vector<16x128xf32>
    %141 = tpu.matmul %140, %138, %cst_73 {dimension_numbers = #tpu.dot_dimension_numbers<[1], [0], [0], [1], [0, 0, 1, 1], [], []>} : vector<16x128xbf16>, vector<128x128xbf16>, vector<16x128xf32> -> vector<16x128xf32>
    %142 = vector.broadcast %139 : vector<1x128xf32> to vector<16x128xf32>
    %143 = arith.addf %141, %142 : vector<16x128xf32>
    %cst_74 = arith.constant 0.00999999977 : f32
    %144 = vector.broadcast %cst_74 : f32 to vector<16x128xf32>
    %145 = arith.mulf %144, %143 : vector<16x128xf32>
    %146 = arith.maximumf %143, %145 : vector<16x128xf32>
    %c0_75 = arith.constant 0 : index
    %c0_76 = arith.constant 0 : index
    %147 = vector.load %arg18[%c0_75, %c0_76] : memref<128x320xbf16, #tpu.memory_space<vmem>>, vector<128x320xbf16>
    %c0_77 = arith.constant 0 : index
    %c1792 = arith.constant 1792 : index
    %148 = vector.load %arg19[%c0_77, %c1792] : memref<1x2176xf32, #tpu.memory_space<vmem>>, vector<1x320xf32>
    %149 = arith.truncf %146 : vector<16x128xf32> to vector<16x128xbf16>
    %cst_78 = arith.constant dense<0.000000e+00> : vector<16x320xf32>
    %150 = tpu.matmul %149, %147, %cst_78 {dimension_numbers = #tpu.dot_dimension_numbers<[1], [0], [0], [1], [0, 0, 1, 1], [], []>} : vector<16x128xbf16>, vector<128x320xbf16>, vector<16x320xf32> -> vector<16x320xf32>
    %151 = vector.broadcast %148 : vector<1x320xf32> to vector<16x320xf32>
    %152 = arith.addf %150, %151 : vector<16x320xf32>
    %153 = arith.subf %0, %128 : vector<16x64xf32>
    %c0_79 = arith.constant 0 : index
    %c0_80 = arith.constant 0 : index
    %154 = vector.load %arg3[%c0_79, %c0_80] : memref<1x64xf32, #tpu.memory_space<vmem>>, vector<1x64xf32>
    %155 = vector.broadcast %154 : vector<1x64xf32> to vector<16x64xf32>
    %156 = arith.mulf %153, %155 : vector<16x64xf32>
    %157 = arith.mulf %156, %156 : vector<16x64xf32>
    %cst_81 = arith.constant dense<0.000000e+00> : vector<16xf32>
    %158 = vector.multi_reduction <add>, %157, %cst_81 [1] : vector<16x64xf32> to vector<16xf32>
    %159 = vector.shape_cast %158 : vector<16xf32> to vector<16x1xf32>
    %cst_82 = arith.constant 5.000000e-01 : f32
    %160 = vector.broadcast %cst_82 : f32 to vector<16x1xf32>
    %161 = arith.mulf %160, %159 : vector<16x1xf32>
    %cst_83 = arith.constant 1.000000e+00 : f32
    %162 = vector.broadcast %cst_83 : f32 to vector<16x8xf32>
    %163 = arith.addf %162, %27 : vector<16x8xf32>
    %164 = arith.mulf %25, %25 : vector<16x8xf32>
    %165 = arith.subf %163, %164 : vector<16x8xf32>
    %166 = math.exp %27 : vector<16x8xf32>
    %167 = arith.subf %165, %166 : vector<16x8xf32>
    %cst_84 = arith.constant -5.000000e-01 : f32
    %168 = vector.broadcast %cst_84 : f32 to vector<16x8xf32>
    %169 = arith.mulf %168, %167 : vector<16x8xf32>
    %cst_85 = arith.constant dense<0.000000e+00> : vector<16xf32>
    %170 = vector.multi_reduction <add>, %169, %cst_85 [1] : vector<16x8xf32> to vector<16xf32>
    %171 = vector.shape_cast %170 : vector<16xf32> to vector<16x1xf32>
    %cst_86 = arith.constant 1.000000e+00 : f32
    %172 = vector.broadcast %cst_86 : f32 to vector<16x1xf32>
    %173 = arith.mulf %172, %171 : vector<16x1xf32>
    %174 = vector.extract_strided_slice %152 {offsets = [0, 0], sizes = [16, 160], strides = [1, 1]} : vector<16x320xf32> to vector<16x160xf32>
    %175 = vector.extract_strided_slice %152 {offsets = [0, 160], sizes = [16, 160], strides = [1, 1]} : vector<16x320xf32> to vector<16x160xf32>
    %176 = tpu.concatenate %26, %26, %26, %26, %26, %26, %26, %26, %26, %26 in 1 : vector<16x16xf32>, vector<16x16xf32>, vector<16x16xf32>, vector<16x16xf32>, vector<16x16xf32>, vector<16x16xf32>, vector<16x16xf32>, vector<16x16xf32>, vector<16x16xf32>, vector<16x16xf32> -> vector<16x160xf32>
    %177 = tpu.concatenate %28, %28, %28, %28, %28, %28, %28, %28, %28, %28 in 1 : vector<16x16xf32>, vector<16x16xf32>, vector<16x16xf32>, vector<16x16xf32>, vector<16x16xf32>, vector<16x16xf32>, vector<16x16xf32>, vector<16x16xf32>, vector<16x16xf32>, vector<16x16xf32> -> vector<16x160xf32>
    %178 = arith.subf %176, %174 : vector<16x160xf32>
    %cst_87 = arith.constant -1.000000e+00 : f32
    %179 = vector.broadcast %cst_87 : f32 to vector<16x160xf32>
    %180 = arith.addf %179, %175 : vector<16x160xf32>
    %181 = arith.subf %180, %177 : vector<16x160xf32>
    %182 = arith.subf %177, %175 : vector<16x160xf32>
    %183 = math.exp %182 : vector<16x160xf32>
    %184 = arith.addf %181, %183 : vector<16x160xf32>
    %185 = arith.mulf %178, %178 : vector<16x160xf32>
    %cst_88 = arith.constant 0.000000e+00 : f32
    %186 = vector.broadcast %cst_88 : f32 to vector<16x160xf32>
    %187 = arith.subf %186, %175 : vector<16x160xf32>
    %188 = math.exp %187 : vector<16x160xf32>
    %189 = arith.mulf %185, %188 : vector<16x160xf32>
    %190 = arith.addf %184, %189 : vector<16x160xf32>
    %cst_89 = arith.constant 5.000000e-01 : f32
    %191 = vector.broadcast %cst_89 : f32 to vector<16x160xf32>
    %192 = arith.mulf %191, %190 : vector<16x160xf32>
    %193 = tpu.iota {dimensions = array<i32: 0>} : vector<160x10xi32>
    %194 = tpu.iota {dimensions = array<i32: 1>} : vector<160x10xi32>
    %c16_i32 = arith.constant 16 : i32
    %195 = vector.broadcast %c16_i32 : i32 to vector<160x10xi32>
    %196 = arith.muli %194, %195 : vector<160x10xi32>
    %197 = arith.cmpi sge, %193, %196 : vector<160x10xi32>
    %c1_i32 = arith.constant 1 : i32
    %198 = vector.broadcast %c1_i32 : i32 to vector<160x10xi32>
    %199 = arith.addi %194, %198 : vector<160x10xi32>
    %c16_i32_90 = arith.constant 16 : i32
    %200 = vector.broadcast %c16_i32_90 : i32 to vector<160x10xi32>
    %201 = arith.muli %199, %200 : vector<160x10xi32>
    %202 = arith.cmpi slt, %193, %201 : vector<160x10xi32>
    %203 = arith.andi %197, %202 : vector<160x10xi1>
    %cst_91 = arith.constant 1.000000e+00 : f32
    %cst_92 = arith.constant 0.000000e+00 : f32
    %204 = vector.broadcast %cst_91 : f32 to vector<160x10xf32>
    %205 = vector.broadcast %cst_92 : f32 to vector<160x10xf32>
    %206 = arith.select %203, %204, %205 : vector<160x10xi1>, vector<160x10xf32>
    %cst_93 = arith.constant dense<0.000000e+00> : vector<16x10xf32>
    %207 = tpu.matmul %192, %206, %cst_93 {dimension_numbers = #tpu.dot_dimension_numbers<[1], [0], [0], [1], [0, 0, 1, 1], [], []>} : vector<16x160xf32>, vector<160x10xf32>, vector<16x10xf32> -> vector<16x10xf32>
    %208 = arith.mulf %104, %207 : vector<16x10xf32>
    %cst_94 = arith.constant dense<0.000000e+00> : vector<16xf32>
    %209 = vector.multi_reduction <add>, %208, %cst_94 [1] : vector<16x10xf32> to vector<16xf32>
    %210 = vector.shape_cast %209 : vector<16xf32> to vector<16x1xf32>
    %cst_95 = arith.constant 1.000000e+00 : f32
    %211 = vector.broadcast %cst_95 : f32 to vector<16x1xf32>
    %212 = arith.mulf %211, %210 : vector<16x1xf32>
    %c0_96 = arith.constant 0 : index
    %c0_97 = arith.constant 0 : index
    %213 = vector.load %arg20[%c0_96, %c0_97] : memref<16x512xf32, #tpu.memory_space<vmem>>, vector<16x48xf32>
    tpu.vector_store %arg20[%c0_96, %c0_97], %24 {strides = array<i32>} : memref<16x512xf32, #tpu.memory_space<vmem>>, vector<16x48xf32>,
    %c0_98 = arith.constant 0 : index
    %c48 = arith.constant 48 : index
    %214 = vector.load %arg20[%c0_98, %c48] : memref<16x512xf32, #tpu.memory_space<vmem>>, vector<16x24xf32>
    tpu.vector_store %arg20[%c0_98, %c48], %42 {strides = array<i32>} : memref<16x512xf32, #tpu.memory_space<vmem>>, vector<16x24xf32>,
    %c0_99 = arith.constant 0 : index
    %c72 = arith.constant 72 : index
    %215 = vector.load %arg20[%c0_99, %c72] : memref<16x512xf32, #tpu.memory_space<vmem>>, vector<16x10xf32>
    tpu.vector_store %arg20[%c0_99, %c72], %104 {strides = array<i32>} : memref<16x512xf32, #tpu.memory_space<vmem>>, vector<16x10xf32>,
    %c0_100 = arith.constant 0 : index
    %c82 = arith.constant 82 : index
    %216 = vector.load %arg20[%c0_100, %c82] : memref<16x512xf32, #tpu.memory_space<vmem>>, vector<16x10xf32>
    tpu.vector_store %arg20[%c0_100, %c82], %90 {strides = array<i32>} : memref<16x512xf32, #tpu.memory_space<vmem>>, vector<16x10xf32>,
    %c0_101 = arith.constant 0 : index
    %c92 = arith.constant 92 : index
    %217 = vector.load %arg20[%c0_101, %c92] : memref<16x512xf32, #tpu.memory_space<vmem>>, vector<16x64xf32>
    tpu.vector_store %arg20[%c0_101, %c92], %128 {strides = array<i32>} : memref<16x512xf32, #tpu.memory_space<vmem>>, vector<16x64xf32>,
    %c0_102 = arith.constant 0 : index
    %c156 = arith.constant 156 : index
    %218 = vector.load %arg20[%c0_102, %c156] : memref<16x512xf32, #tpu.memory_space<vmem>>, vector<16x320xf32>
    tpu.vector_store %arg20[%c0_102, %c156], %152 {strides = array<i32>} : memref<16x512xf32, #tpu.memory_space<vmem>>, vector<16x320xf32>,
    %c0_103 = arith.constant 0 : index
    %c476 = arith.constant 476 : index
    %219 = vector.load %arg20[%c0_103, %c476] : memref<16x512xf32, #tpu.memory_space<vmem>>, vector<16x1xf32>
    tpu.vector_store %arg20[%c0_103, %c476], %161 {strides = array<i32>} : memref<16x512xf32, #tpu.memory_space<vmem>>, vector<16x1xf32>,
    %c0_104 = arith.constant 0 : index
    %c477 = arith.constant 477 : index
    %220 = vector.load %arg20[%c0_104, %c477] : memref<16x512xf32, #tpu.memory_space<vmem>>, vector<16x1xf32>
    tpu.vector_store %arg20[%c0_104, %c477], %212 {strides = array<i32>} : memref<16x512xf32, #tpu.memory_space<vmem>>, vector<16x1xf32>,
    %c0_105 = arith.constant 0 : index
    %c478 = arith.constant 478 : index
    %221 = vector.load %arg20[%c0_105, %c478] : memref<16x512xf32, #tpu.memory_space<vmem>>, vector<16x1xf32>
    tpu.vector_store %arg20[%c0_105, %c478], %173 {strides = array<i32>} : memref<16x512xf32, #tpu.memory_space<vmem>>, vector<16x1xf32>,
    %cst_106 = arith.constant 0.000000e+00 : f32
    %222 = vector.broadcast %cst_106 : f32 to vector<16x33xf32>
    %c0_107 = arith.constant 0 : index
    %c479 = arith.constant 479 : index
    %223 = vector.load %arg20[%c0_107, %c479] : memref<16x512xf32, #tpu.memory_space<vmem>>, vector<16x33xf32>
    tpu.vector_store %arg20[%c0_107, %c479], %222 {strides = array<i32>} : memref<16x512xf32, #tpu.memory_space<vmem>>, vector<16x33xf32>,
    return
  }
  func.func @transform_0(%arg0: i32) -> (i32, i32) {
    %c0_i32 = arith.constant 0 : i32
    %c0_i32_0 = arith.constant 0 : i32
    return %arg0, %c0_i32 : i32, i32
  }
  func.func @transform_1(%arg0: i32) -> (i32, i32) {
    %c0_i32 = arith.constant 0 : i32
    %c0_i32_0 = arith.constant 0 : i32
    return %arg0, %c0_i32 : i32, i32
  }
  func.func @transform_2(%arg0: i32) -> (i32, i32) {
    %c0_i32 = arith.constant 0 : i32
    %c0_i32_0 = arith.constant 0 : i32
    %c0_i32_1 = arith.constant 0 : i32
    return %c0_i32, %c0_i32_0 : i32, i32
  }
  func.func @transform_3(%arg0: i32) -> (i32, i32) {
    %c0_i32 = arith.constant 0 : i32
    %c0_i32_0 = arith.constant 0 : i32
    %c0_i32_1 = arith.constant 0 : i32
    return %c0_i32, %c0_i32_0 : i32, i32
  }
  func.func @transform_4(%arg0: i32) -> (i32, i32) {
    %c0_i32 = arith.constant 0 : i32
    %c0_i32_0 = arith.constant 0 : i32
    %c0_i32_1 = arith.constant 0 : i32
    return %c0_i32, %c0_i32_0 : i32, i32
  }
  func.func @transform_5(%arg0: i32) -> (i32, i32) {
    %c0_i32 = arith.constant 0 : i32
    %c0_i32_0 = arith.constant 0 : i32
    %c0_i32_1 = arith.constant 0 : i32
    return %c0_i32, %c0_i32_0 : i32, i32
  }
  func.func @transform_6(%arg0: i32) -> (i32, i32) {
    %c0_i32 = arith.constant 0 : i32
    %c0_i32_0 = arith.constant 0 : i32
    %c0_i32_1 = arith.constant 0 : i32
    return %c0_i32, %c0_i32_0 : i32, i32
  }
  func.func @transform_7(%arg0: i32) -> (i32, i32) {
    %c0_i32 = arith.constant 0 : i32
    %c0_i32_0 = arith.constant 0 : i32
    %c0_i32_1 = arith.constant 0 : i32
    return %c0_i32, %c0_i32_0 : i32, i32
  }
  func.func @transform_8(%arg0: i32) -> (i32, i32) {
    %c0_i32 = arith.constant 0 : i32
    %c0_i32_0 = arith.constant 0 : i32
    %c0_i32_1 = arith.constant 0 : i32
    return %c0_i32, %c0_i32_0 : i32, i32
  }
  func.func @transform_9(%arg0: i32) -> (i32, i32) {
    %c0_i32 = arith.constant 0 : i32
    %c0_i32_0 = arith.constant 0 : i32
    %c0_i32_1 = arith.constant 0 : i32
    return %c0_i32, %c0_i32_0 : i32, i32
  }
  func.func @transform_10(%arg0: i32) -> (i32, i32) {
    %c0_i32 = arith.constant 0 : i32
    %c0_i32_0 = arith.constant 0 : i32
    %c0_i32_1 = arith.constant 0 : i32
    return %c0_i32, %c0_i32_0 : i32, i32
  }
  func.func @transform_11(%arg0: i32) -> (i32, i32) {
    %c0_i32 = arith.constant 0 : i32
    %c0_i32_0 = arith.constant 0 : i32
    %c0_i32_1 = arith.constant 0 : i32
    return %c0_i32, %c0_i32_0 : i32, i32
  }
  func.func @transform_12(%arg0: i32) -> (i32, i32) {
    %c0_i32 = arith.constant 0 : i32
    %c0_i32_0 = arith.constant 0 : i32
    %c0_i32_1 = arith.constant 0 : i32
    return %c0_i32, %c0_i32_0 : i32, i32
  }
  func.func @transform_13(%arg0: i32) -> (i32, i32) {
    %c0_i32 = arith.constant 0 : i32
    %c0_i32_0 = arith.constant 0 : i32
    %c0_i32_1 = arith.constant 0 : i32
    return %c0_i32, %c0_i32_0 : i32, i32
  }
  func.func @transform_14(%arg0: i32) -> (i32, i32) {
    %c0_i32 = arith.constant 0 : i32
    %c0_i32_0 = arith.constant 0 : i32
    %c0_i32_1 = arith.constant 0 : i32
    return %c0_i32, %c0_i32_0 : i32, i32
  }
  func.func @transform_15(%arg0: i32) -> (i32, i32) {
    %c0_i32 = arith.constant 0 : i32
    %c0_i32_0 = arith.constant 0 : i32
    %c0_i32_1 = arith.constant 0 : i32
    return %c0_i32, %c0_i32_0 : i32, i32
  }
  func.func @transform_16(%arg0: i32) -> (i32, i32) {
    %c0_i32 = arith.constant 0 : i32
    %c0_i32_0 = arith.constant 0 : i32
    %c0_i32_1 = arith.constant 0 : i32
    return %c0_i32, %c0_i32_0 : i32, i32
  }
  func.func @transform_17(%arg0: i32) -> (i32, i32) {
    %c0_i32 = arith.constant 0 : i32
    %c0_i32_0 = arith.constant 0 : i32
    %c0_i32_1 = arith.constant 0 : i32
    return %c0_i32, %c0_i32_0 : i32, i32
  }
  func.func @transform_18(%arg0: i32) -> (i32, i32) {
    %c0_i32 = arith.constant 0 : i32
    %c0_i32_0 = arith.constant 0 : i32
    %c0_i32_1 = arith.constant 0 : i32
    return %c0_i32, %c0_i32_0 : i32, i32
  }
  func.func @transform_19(%arg0: i32) -> (i32, i32) {
    %c0_i32 = arith.constant 0 : i32
    %c0_i32_0 = arith.constant 0 : i32
    return %arg0, %c0_i32 : i32, i32
  }
}

</mosaic_0001>

<bundles_post_ra>
// kernel: _forward_impl.1
= control target key start
LH: loop header
LB: loop body
LE: loop exit
PB: predicated region body
PF: predicated region fallthrough
CT: control target
= control target key end

     0   :  { %s4410_s0 = inlined_call_operand.vmem [shape: f32[16,64], index: 0, kind: input, shape index: {}]   ;;  %s4411_s1 = inlined_call_operand.vmem [shape: f32[16,24], index: 1, kind: input, shape index: {}]   ;;  %s4412_s2 = inlined_call_operand.vmem [shape: f32[1,64], index: 2, kind: input, shape index: {}]   ;;  %s4413_s3 = inlined_call_operand.hbm [shape: bf16[64,128], index: 3, kind: input, shape index: {}]   ;;  %s4414_s4 = inlined_call_operand.vmem [shape: bf16[128,128], index: 4, kind: input, shape index: {}]   ;;  %s4415_s5 = inlined_call_operand.vmem [shape: bf16[128,48], index: 5, kind: input, shape index: {}]   ;;  %s4416_s6 = inlined_call_operand.hbm [shape: bf16[24,128], index: 6, kind: input, shape index: {}]   ;;  %s4417_s7 = inlined_call_operand.vmem [shape: bf16[128,128], index: 7, kind: input, shape index: {}]   ;;  %s4418_s8 = inlined_call_operand.vmem [shape: bf16[128,10], index: 8, kind: input, shape index: {}]   ;;  %s4419_s9 = inlined_call_operand.hbm [shape: bf16[24,128], index: 9, kind: input, shape index: {}]   ;;  %s4420_s10 = inlined_call_operand.vmem [shape: bf16[128,128], index: 10, kind: input, shape index: {}]   ;;  %s4421_s11 = inlined_call_operand.vmem [shape: bf16[128,10], index: 11, kind: input, shape index: {}]   ;;  %s4422_s12 = inlined_call_operand.vmem [shape: bf16[16,128], index: 12, kind: input, shape index: {}]   ;;  %s4423_s13 = inlined_call_operand.vmem [shape: bf16[128,128], index: 13, kind: input, shape index: {}]   ;;  %s4424_s14 = inlined_call_operand.vmem [shape: bf16[128,64], index: 14, kind: input, shape index: {}]   ;;  %s4425_s15 = inlined_call_operand.hbm [shape: bf16[8,128], index: 15, kind: input, shape index: {}]   ;;  %s4426_s16 = inlined_call_operand.vmem [shape: bf16[128,128], index: 16, kind: input, shape index: {}]   ;;  %s4427_s17 = inlined_call_operand.vmem [shape: bf16[128,320], index: 17, kind: input, shape index: {}]   ;;  %s4428_s18 = inlined_call_operand.vmem [shape: f32[1,2176], index: 18, kind: input, shape index: {}]   ;;  %s4429_s19 = inlined_call_operand.vmem [shape: f32[16,512], index: 19, kind: output, shape index: {}]  }
   0x1   :  { %4437 = sst [smem:[#allocation12_spill]] %s4410_s0 }
   0x2   :  { %4438 = sst [smem:[#allocation13_spill]] %s4411_s1 }
   0x3   :  { %4439 = sst [smem:[#allocation14_spill]] %s4412_s2 }
   0x4   :  { %4440 = sst [smem:[#allocation15_spill]] %s4413_s3 }
   0x5   :  { %4441 = sst [smem:[#allocation16_spill]] %s4427_s17 }
   0x6   :  { %24 = vsyncpa [#allocation3], 0 }
   0x7   :  { %25 = vsyncpa [#allocation5], 0 }
   0x8   :  { %26 = vsyncpa [#allocation8], 0  ;;  %s3247_s0 = smov [#allocation4]   ;;  %s3248_s20 = smov [#allocation2]  }
   0x9   :  { %s54_s30 = sshll.u32 %s3247_s0, 4  ;;  %s38_s21 = sshll.u32 %s3248_s20, 4  ;;  %s55_s30 = int_to_ptr.vmem [resolvable:$true] %s54_s30  ;;  %s3375_s21 = int_to_ptr.vmem [resolvable:$true] %s38_s21 }
   0xa   :  { %s3153_s2 = scalar_lea.hbm %s4416_s6, 192 }
   0xb   :  { %p3154_p0 = scmp.ne.s32.totalorder %s4416_s6, %s3153_s2  ;;  %p3157_p1 = scmp.lt.u32.totalorder %s3153_s2, %s4416_s6 }
   0xd   :  { %p3159_p2 = pnand %p3157_p1, %p3154_p0 }
   0xf   :  { %3162 = shalt.err (!%p3159_p2)
}
  0x10   :  { %s3163_s26 = scalar_lea.vmem %s55_s30, 192  ;;  %p3168_p4 = scmp.lt.s32.totalorder %s55_s30, %s55_s30 }
  0x11   :  { %p3164_p3 = scmp.ne.s32.totalorder %s55_s30, %s3163_s26  ;;  %p3169_p5 = scmp.lt.s32.totalorder %s3163_s26, %s3163_s26 }
  0x13   :  { %p3170_p6 = por %p3169_p5, %p3168_p4 }
  0x15   :  { %p3171_p7 = pnand %p3170_p6, %p3164_p3 }
  0x17   :  { %3174 = shalt.err (!%p3171_p7)
}
  0x18   :  { %s3249_s27 = smov 64   ;;  %s3250_s28 = smov 4  }
  0x19   :  { %60 = dma.hbm_to_vmem [thread:$0]  %s4416_s6, 192, %s55_s30, [#allocation5], %s3249_s27, %s3249_s27, %s3250_s28  }
  0x1a   :  { %s4442_s22 = sld [smem:[#allocation15_spill]] }
  0x20   :  { %s3175_s2 = scalar_lea.hbm %s4442_s22, 512 }
  0x21   :  { %p3176_p8 = scmp.ne.s32.totalorder %s4442_s22, %s3175_s2  ;;  %p3179_p9 = scmp.lt.u32.totalorder %s3175_s2, %s4442_s22 }
  0x23   :  { %p3181_p10 = pnand %p3179_p9, %p3176_p8 }
  0x25   :  { %3184 = shalt.err (!%p3181_p10)
}
  0x26   :  { %s3185_s26 = scalar_lea.vmem %s3375_s21, 512  ;;  %p3190_p12 = scmp.lt.s32.totalorder %s3375_s21, %s3375_s21 }
  0x27   :  { %p3186_p11 = scmp.ne.s32.totalorder %s3375_s21, %s3185_s26  ;;  %p3191_p13 = scmp.lt.s32.totalorder %s3185_s26, %s3185_s26 }
  0x29   :  { %p3192_p0 = por %p3191_p13, %p3190_p12 }
  0x2b   :  { %p3193_p1 = pnand %p3192_p0, %p3186_p11 }
  0x2d   :  { %3196 = shalt.err (!%p3193_p1)
}
  0x2e   :  { %44 = dma.hbm_to_vmem [thread:$0]  %s4442_s22, 512, %s3375_s21, [#allocation3], %s3249_s27, %s3249_s27, %s3250_s28  }
  0x2f   :  { %s3251_s29 = smov [#allocation6]   ;;  %s3252_s20 = smov [#allocation7]  }
  0x30   :  { %s70_s0 = sshll.u32 %s3251_s29, 4  ;;  %s93_s1 = sshll.u32 %s3252_s20, 4  ;;  %s71_s0 = int_to_ptr.vmem [resolvable:$true] %s70_s0  ;;  %s94_s1 = int_to_ptr.vmem [resolvable:$true] %s93_s1 }
  0x31   :  { %s3197_s24 = scalar_lea.hbm %s4419_s9, 192 }
  0x32   :  { %p3198_p2 = scmp.ne.s32.totalorder %s4419_s9, %s3197_s24  ;;  %p3201_p3 = scmp.lt.u32.totalorder %s3197_s24, %s4419_s9 }
  0x34   :  { %p3203_p4 = pnand %p3201_p3, %p3198_p2 }
  0x36   :  { %3206 = shalt.err (!%p3203_p4)
}
  0x37   :  { %s3207_s21 = scalar_lea.vmem %s71_s0, 192  ;;  %p3212_p6 = scmp.lt.s32.totalorder %s71_s0, %s71_s0 }
  0x38   :  { %p3208_p5 = scmp.ne.s32.totalorder %s71_s0, %s3207_s21  ;;  %p3213_p7 = scmp.lt.s32.totalorder %s3207_s21, %s3207_s21 }
  0x3a   :  { %p3214_p8 = por %p3213_p7, %p3212_p6 }
  0x3c   :  { %p3215_p9 = pnand %p3214_p8, %p3208_p5 }
  0x3e   :  { %3218 = shalt.err (!%p3215_p9)
}
  0x3f   :  { %76 = dma.hbm_to_vmem [thread:$0]  %s4419_s9, 192, %s71_s0, [#allocation5], %s3249_s27, %s3249_s27, %s3250_s28  }
  0x40   :  { %s3219_s17 = scalar_lea.hbm %s4425_s15, 64 }
  0x41   :  { %p3220_p10 = scmp.ne.s32.totalorder %s4425_s15, %s3219_s17  ;;  %p3223_p11 = scmp.lt.u32.totalorder %s3219_s17, %s4425_s15 }
  0x43   :  { %p3225_p12 = pnand %p3223_p11, %p3220_p10 }
  0x45   :  { %3228 = shalt.err (!%p3225_p12)
}
  0x46   :  { %s3229_s25 = scalar_lea.vmem %s94_s1, 64  ;;  %p3234_p0 = scmp.lt.s32.totalorder %s94_s1, %s94_s1 }
  0x47   :  { %p3230_p13 = scmp.ne.s32.totalorder %s94_s1, %s3229_s25  ;;  %p3235_p1 = scmp.lt.s32.totalorder %s3229_s25, %s3229_s25 }
  0x49   :  { %p3236_p2 = por %p3235_p1, %p3234_p0 }
  0x4b   :  { %p3237_p3 = pnand %p3236_p2, %p3230_p13 }
  0x4d   :  { %3240 = shalt.err (!%p3237_p3)
}
  0x4e   :  { %96 = dma.hbm_to_vmem [thread:$0]  %s4425_s15, 64, %s94_s1, [#allocation8]  }
  0x4f   :  { %3241 = dma.done.wait [#allocation3], 512  }
  0x50   :  { %3242 = vsyncadd [#allocation3], 4294966784 }
  0x51   :  { %3243 = dma.done.wait [#allocation5], 384  }
  0x52   :  { %3244 = vsyncadd [#allocation5], 4294966912 }
  0x53   :  { %3245 = dma.done.wait [#allocation8], 64  }
  0x54   :  { %3246 = vsyncadd [#allocation8], 4294967232  ;;  %v3253_v0 = vmov 0.0   ;;  %vm3254_vm0 = vmmov 0   ;;  %v3006_v1 = vld [vmem:[#allocation2] sm:$0xff]   ;;  %v3007_v2 = vld [vmem:[#allocation2 + $0x8] sm:$0xff]  }
  0x55   :  { %2708 = vmatprep.subr.bf16.mxu0 %v3253_v0  ;;  %2716 = vmatprep.mubr.msk.bf16.mxu0 %vm3254_vm0, %v3253_v0  ;;  %v3010_v3 = vld [vmem:[%s4414_s4] sm:$0xff]   ;;  %v3008_v4 = vld [vmem:[#allocation2 + $0x10] sm:$0xff]   ;;  %v3011_v5 = vld [vmem:[%s4414_s4 + $0x8] sm:$0xff]   ;;  %s4443_s22 = sld [smem:[#allocation12_spill]]  ;;  %vm4435_vm1 = vcmask 523264   ;;  %vm1931_vm2 = vcmask 392192  }
  0x56   :  { %2720 = vmatprep.subr.bf16.mxu1 %v3253_v0  ;;  %2736 = vmatprep.mubr.msk.bf16.mxu1 %vm3254_vm0, %v3253_v0  ;;  %v3009_v6 = vld [vmem:[#allocation2 + $0x18] sm:$0xff]   ;;  %v3012_v9 = vld [vmem:[%s4414_s4 + $0x10] sm:$0xff]   ;;  %v3014_v12 = vld [vmem:[%s4414_s4 + $0x20] sm:$0xff]   ;;  %vm482_vm3 = vcmask 1043456   ;;  %s3255_s17 = smov 104   ;;  %s3256_s20 = smov 112  }
  0x57   :  { %2709 = vmatpush3.bf16.msra.mxu0 %v3006_v1  ;;  %2721 = vmatpush3.bf16.msra.mxu1 %v3010_v3  ;;  %v3013_v11 = vld [vmem:[%s4414_s4 + $0x18] sm:$0xff]   ;;  %v3015_v13 = vld [vmem:[%s4414_s4 + $0x28] sm:$0xff]   ;;  %v3016_v14 = vld [vmem:[%s4414_s4 + $0x30] sm:$0xff]   ;;  %s3257_s2 = smov 32   ;;  %s3258_s23 = smov 80   ;;  %vm478_vm4 = vcmask 195584  }
  0x58   :  { %2710 = vmatprep.subr.bf16.mxu0 %v3253_v0  ;;  %2722 = vmatprep.subr.bf16.mxu1 %v3253_v0  ;;  %v3017_v15 = vld [vmem:[%s4414_s4 + $0x38] sm:$0xff]   ;;  %v3018_v16 = vld [vmem:[%s4415_s5] sm:$0xff]   ;;  %v3019_v17 = vld [vmem:[%s4415_s5 + $0x8] sm:$0xff]   ;;  %s3259_s24 = smov 48   ;;  %s3260_s25 = smov 8   ;;  %vm1103_vm5 = vcmask 130048  }
  0x59   :  { %v3020_v18 = vld [vmem:[%s4415_s5 + $0x10] sm:$0xff]   ;;  %v3021_v19 = vld [vmem:[%s4415_s5 + $0x18] sm:$0xff]   ;;  %v3022_v20 = vld [vmem:[%s4415_s5 + $0x20] sm:$0xff]   ;;  %s3261_s9 = smov 40   ;;  %s3262_s28 = smov 120   ;;  %vm4434_vm6 = vcmask 64512  }
  0x5a   :  { %v2456_v21 = vld [vmem:[%s4428_s18] ss:$0 sm:$0xff]  ;;  %v3023_v33 = vld [vmem:[%s4415_s5 + $0x28] sm:$0xff]   ;;  %v3024_v34 = vld [vmem:[%s4415_s5 + $0x30] sm:$0xff]   ;;  %s3263_s15 = smov 72   ;;  %s3264_s0 = smov 88  }
  0x5b   :  { %2711 = vmatpush3.bf16.msra.mxu0 %v3007_v2  ;;  %v116_v7 = vld [vmem:[%s4443_s22] sm:$0xff]  ;;  %v117_v8 = vld [vmem:[%s4443_s22 + $0x8] sm:$0xff]  ;;  %2723 = vmatpush3.bf16.msra.mxu1 %v3011_v5  ;;  %v3025_v35 = vld [vmem:[%s4415_s5 + $0x38] sm:$0xff]   ;;  %s4444_s26 = sld [smem:[#allocation13_spill]]  ;;  %s3265_s6 = smov 96   ;;  %vm1928_vm7 = vcmask 261120  }
  0x5c   :  { %2712 = vmatprep.subr.bf16.mxu0 %v3253_v0  ;;  %2724 = vmatprep.subr.bf16.mxu1 %v3253_v0  ;;  %v127_v10 = vpack.c.bf16 %v117_v8, %v116_v7  ;;  %v2462_v36 = vld [vmem:[%s4428_s18 + $0x1] ss:$0 sm:$0xff]  ;;  %v2471_v48 = vld [vmem:[%s4428_s18 + $0x2] ss:$0 sm:$0xff]  ;;  %v3027_v60 = vld [vmem:[#allocation4 + $0x8] ss:$0 sps:$4 sm:$0xff]  }
  0x5d   :  { %v3026_v58 = vld [vmem:[#allocation4] sm:$0xff]   ;;  %v484_v61 = vsel %vm482_vm3, %v3027_v60, 0  ;;  %s3266_s30 = smov 16   ;;  %s3267_s29 = smov 24   ;;  %vm1936_vm8 = vcmask 654336   ;;  %vm4436_vm9 = vcmask 785408  }
  0x5e   :  { %vm1942_vm10 = vcmask 916480  }
  0x5f   :  { %2713 = vmatpush3.bf16.msra.mxu0 %v3008_v4  ;;  %2725 = vmatpush3.bf16.msra.mxu1 %v3012_v9 }
  0x60   :  { %2714 = vmatprep.subr.bf16.mxu0 %v3253_v0  ;;  %2726 = vmatprep.subr.bf16.mxu1 %v3253_v0 }
  0x61   :  { %v437_v1 = vld [vmem:[%s4444_s26] sm:$0xff]  ;;  %v438_v3 = vld [vmem:[%s4444_s26 + $0x8] sm:$0xff] }
  0x63   :  { %2715 = vmatpush3.bf16.msra.mxu0 %v3009_v6  ;;  %2727 = vmatpush3.bf16.msra.mxu1 %v3013_v11  ;;  %v3029_v11 = vld [vmem:[%s4417_s7 + $0x8] sm:$0xff]  }
  0x64   :  { %2740 = vmatprep.subr.bf16.mxu0 %v3253_v0  ;;  %2728 = vmatprep.subr.bf16.mxu1 %v3253_v0 }
  0x66   :  { %2717 = vmatmul.mubr.msk.bf16.vlgmr.msra.gmra.mrb[0].mxu0 %vm4435_vm1, %v127_v10  ;;  %v3028_v10 = vld [vmem:[%s4417_s7] sm:$0xff]  }
  0x67   :  { %2756 = vmatprep.mubr.msk.bf16.mxu0 %vm3254_vm0, %v3253_v0  ;;  %2729 = vmatpush3.bf16.msra.mxu1 %v3014_v12  ;;  %v3030_v12 = vld [vmem:[%s4417_s7 + $0x10] sm:$0xff]  }
  0x68   :  { %2730 = vmatprep.subr.bf16.mxu1 %v3253_v0  ;;  %2741 = vmatpush3.bf16.msra.mxu0 %v3018_v16  ;;  %v3034_v16 = vld [vmem:[%s4417_s7 + $0x30] sm:$0xff]  }
  0x69   :  { %2742 = vmatprep.subr.bf16.mxu0 %v3253_v0 }
  0x6b   :  { %2731 = vmatpush3.bf16.msra.mxu1 %v3015_v13  ;;  %v3031_v13 = vld [vmem:[%s4417_s7 + $0x18] sm:$0xff]  }
  0x6c   :  { %2732 = vmatprep.subr.bf16.mxu1 %v3253_v0  ;;  %2743 = vmatpush3.bf16.msra.mxu0 %v3019_v17  ;;  %v3035_v17 = vld [vmem:[%s4417_s7 + $0x38] sm:$0xff]  }
  0x6d   :  { %2744 = vmatprep.subr.bf16.mxu0 %v3253_v0 }
  0x6f   :  { %2733 = vmatpush3.bf16.msra.mxu1 %v3016_v14  ;;  %v3032_v14 = vld [vmem:[%s4417_s7 + $0x20] sm:$0xff]  }
  0x70   :  { %2734 = vmatprep.subr.bf16.mxu1 %v3253_v0  ;;  %2745 = vmatpush3.bf16.msra.mxu0 %v3020_v18  ;;  %v3038_v18 = vld [vmem:[%s4418_s8] sm:$0xff]  }
  0x71   :  { %2746 = vmatprep.subr.bf16.mxu0 %v3253_v0 }
  0x73   :  { %2735 = vmatpush3.bf16.msra.mxu1 %v3017_v15  ;;  %v3033_v15 = vld [vmem:[%s4417_s7 + $0x28] sm:$0xff]  }
  0x74   :  { %2760 = vmatprep.subr.bf16.mxu1 %v3253_v0  ;;  %2747 = vmatpush3.bf16.msra.mxu0 %v3021_v19  ;;  %v3039_v19 = vld [vmem:[%s4418_s8 + $0x8] sm:$0xff]  }
  0x75   :  { %2748 = vmatprep.subr.bf16.mxu0 %v3253_v0 }
  0x78   :  { %2749 = vmatpush3.bf16.msra.mxu0 %v3022_v20  ;;  %v3040_v20 = vld [vmem:[%s4418_s8 + $0x10] sm:$0xff]  }
  0x79   :  { %2750 = vmatprep.subr.bf16.mxu0 %v3253_v0 }
  0x7c   :  { %2751 = vmatpush3.bf16.msra.mxu0 %v3023_v33 }
  0x7d   :  { %2752 = vmatprep.subr.bf16.mxu0 %v3253_v0 }
  0x80   :  { %2753 = vmatpush3.bf16.msra.mxu0 %v3024_v34 }
  0x81   :  { %2754 = vmatprep.subr.bf16.mxu0 %v3253_v0 }
  0x84   :  { %2755 = vmatpush3.bf16.msra.mxu0 %v3025_v35  ;;  %v3036_v35 = vld [vmem:[#allocation6] sm:$0xff]  }
  0x85   :  { %2788 = vmatprep.subr.bf16.mxu0 %v3253_v0 }
 0x139   :  { %v196_v22 = vpop.f32.mrb[0].mxu0 }
 0x13a   :  { %v197_v23 = vadd.f32 %v2456_v21, %v196_v22  ;;  %v2718_v24 = vpop.f32.mrb[1].mxu0  ;;  %v3042_v22 = vld [vmem:[%s4418_s8 + $0x20] sm:$0xff]  }
 0x13b   :  { %v199_v25 = vpop.f32.mrb[2].mxu0  ;;  %v2480_v24 = vld [vmem:[%s4428_s18 + $0x3] ss:$0 sm:$0xff] }
 0x13c   :  { %v203_v26 = vmul.f32 0.01, %v197_v23  ;;  %v200_v27 = vadd.f32 %v2456_v21, %v199_v25  ;;  %v2719_v28 = vpop.f32.mrb[3].mxu0  ;;  %v3041_v21 = vld [vmem:[%s4418_s8 + $0x18] sm:$0xff]  }
 0x13e   :  { %v204_v29 = vmul.f32 0.01, %v200_v27  ;;  %v205_v30 = vmax.f32 %v197_v23, %v203_v26  ;;  %v3043_v23 = vld [vmem:[%s4418_s8 + $0x28] sm:$0xff]  }
 0x140   :  { %v206_v31 = vmax.f32 %v200_v27, %v204_v29 }
 0x142   :  { %v224_v32 = vpack.c.bf16 %v206_v31, %v205_v30 }
 0x144   :  { %2737 = vmatmul.mubr.bf16.vlgmr.msra.gmra.mrb[0].mxu1 %v224_v32 }
 0x145   :  { %2764 = vmatprep.mubr.msk.bf16.mxu1 %vm3254_vm0, %v3253_v0  ;;  %2761 = vmatpush3.bf16.msra.mxu1 %v3026_v58 }
 0x146   :  { %2762 = vmatprep.subr.bf16.mxu1 %v3253_v0 }
 0x149   :  { %2763 = vmatpush3.bf16.msra.mxu1 %v484_v61 }
 0x14a   :  { %2768 = vmatprep.subr.bf16.mxu1 %v3253_v0 }
 0x217   :  { %v313_v37 = vpop.f32.mrb[0].mxu1 }
 0x218   :  { %v314_v38 = vadd.f32 %v2462_v36, %v313_v37  ;;  %v2738_v39 = vpop.f32.mrb[1].mxu1  ;;  %v3037_v37 = vld [vmem:[#allocation6 + $0x8] ss:$0 sps:$4 sm:$0xff]  }
 0x219   :  { %v316_v40 = vpop.f32.mrb[2].mxu1  ;;  %v3044_v39 = vld [vmem:[%s4418_s8 + $0x30] sm:$0xff]  }
 0x21a   :  { %v320_v41 = vmul.f32 0.01, %v314_v38  ;;  %v317_v42 = vadd.f32 %v2462_v36, %v316_v40  ;;  %v2739_v43 = vpop.f32.mrb[3].mxu1  ;;  %v3045_v40 = vld [vmem:[%s4418_s8 + $0x38] sm:$0xff]  }
 0x21c   :  { %v321_v44 = vmul.f32 0.01, %v317_v42  ;;  %v322_v45 = vmax.f32 %v314_v38, %v320_v41  ;;  %v781_v38 = vsel %vm482_vm3, %v3037_v37, 0  ;;  %v2484_v41 = vld [vmem:[%s4428_s18 + $0x4] ss:$0 sm:$0xff] }
 0x21e   :  { %v323_v46 = vmax.f32 %v317_v42, %v321_v44 }
 0x220   :  { %v341_v47 = vpack.c.bf16 %v323_v46, %v322_v45 }
 0x222   :  { %2757 = vmatmul.mubr.bf16.vlgmr.msra.gmra.mrb[4].mxu0 %v341_v47 }
 0x223   :  { %2804 = vmatprep.mubr.msk.bf16.mxu0 %vm3254_vm0, %v3253_v0  ;;  %2789 = vmatpush3.bf16.msra.mxu0 %v3038_v18  ;;  %v3056_v18 = vld [vmem:[%s4421_s11 + $0x8] sm:$0xff]  }
 0x224   :  { %2790 = vmatprep.subr.bf16.mxu0 %v3253_v0 }
 0x227   :  { %2791 = vmatpush3.bf16.msra.mxu0 %v3039_v19  ;;  %v3057_v19 = vld [vmem:[%s4421_s11 + $0x10] sm:$0xff]  }
 0x228   :  { %2792 = vmatprep.subr.bf16.mxu0 %v3253_v0 }
 0x22b   :  { %2793 = vmatpush3.bf16.msra.mxu0 %v3040_v20  ;;  %v3058_v20 = vld [vmem:[%s4421_s11 + $0x18] sm:$0xff]  }
 0x22c   :  { %2794 = vmatprep.subr.bf16.mxu0 %v3253_v0 }
 0x22f   :  { %2795 = vmatpush3.bf16.msra.mxu0 %v3041_v21  ;;  %v3059_v21 = vld [vmem:[%s4421_s11 + $0x20] sm:$0xff]  }
 0x230   :  { %2796 = vmatprep.subr.bf16.mxu0 %v3253_v0 }
 0x233   :  { %2797 = vmatpush3.bf16.msra.mxu0 %v3042_v22  ;;  %v3060_v22 = vld [vmem:[%s4421_s11 + $0x28] sm:$0xff]  }
 0x234   :  { %2798 = vmatprep.subr.bf16.mxu0 %v3253_v0 }
 0x237   :  { %2799 = vmatpush3.bf16.msra.mxu0 %v3043_v23  ;;  %v3061_v23 = vld [vmem:[%s4421_s11 + $0x30] sm:$0xff]  }
 0x238   :  { %2800 = vmatprep.subr.bf16.mxu0 %v3253_v0 }
 0x23b   :  { %2801 = vmatpush3.bf16.msra.mxu0 %v3044_v39 }
 0x23c   :  { %2802 = vmatprep.subr.bf16.mxu0 %v3253_v0 }
 0x23f   :  { %2803 = vmatpush3.bf16.msra.mxu0 %v3045_v40 }
 0x240   :  { %2816 = vmatprep.subr.bf16.mxu0 %v3253_v0 }
 0x2f5   :  { %v430_v49 = vpop.f32.mrb[4].mxu0 }
 0x2f6   :  { %v3535_v50 = vadd.f32 %v2471_v48, %v430_v49  ;;  %v2758_v51 = vpop.f32.mrb[5].mxu0 }
 0x2f7   :  { %v433_v52 = vpop.f32.mrb[6].mxu0  ;;  %v2502_v51 = vld [vmem:[%s4428_s18 + $0x6] ss:$0 sm:$0xff] }
 0x2f8   :  { %v3537_v53 = vadd.f32 %v2471_v48, %v433_v52  ;;  %v2759_v54 = vpop.f32.mrb[7].mxu0  ;;  %v439_v55 = vmul.f32 0.5, %v3535_v50  ;;  %2356 = vst.msk [vmem:[%s4429_s19] sm:$0xff] %vm1931_vm2, %v3535_v50 }
 0x2fa   :  { %v441_v56 = vmul.f32 1.442695, %v439_v55  ;;  %v440_v57 = vmul.f32 0.5, %v3537_v53  ;;  %2357 = vst.msk [vmem:[%s4429_s19 + $0x20] sm:$0xff] %vm1931_vm2, %v3537_v53 }
 0x2fc   :  { %3119 = vpow2.f32 %v441_v56  ;;  %v443_v59 = vmul.f32 1.442695, %v440_v57  ;;  %v3046_v56 = vld [vmem:[%s4420_s10] sm:$0xff]  }
 0x2fe   :  { %3121 = vpow2.f32 %v443_v59 }
 0x306   :  { %v3120_v62 = vpop.eup %3119 }
 0x307   :  { %447 = vrot.lane.b32.xlu0 %v3120_v62, %s3255_s17 }
 0x308   :  { %v3122_v63 = vpop.eup %3121 }
 0x30b   :  { %449 = vrot.lane.b32.xlu0 %v3122_v63, %s3255_s17 }
 0x30f   :  { %1951 = vrot.lane.b32.xlu0 %v3535_v50, %s3256_s20 }
 0x313   :  { %1963 = vrot.lane.b32.xlu0 %v3535_v50, %s3257_s2 }
 0x317   :  { %1953 = vrot.lane.b32.xlu0 %v3537_v53, %s3256_s20 }
 0x31b   :  { %1975 = vrot.lane.b32.xlu0 %v3535_v50, %s3249_s27 }
 0x31f   :  { %1981 = vrot.lane.b32.xlu0 %v3535_v50, %s3258_s23 }
 0x323   :  { %1971 = vrot.lane.b32.xlu0 %v3537_v53, %s3259_s24 }
 0x327   :  { %1983 = vrot.lane.b32.xlu0 %v3537_v53, %s3258_s23  ;;  %s3268_s23 = smov 56  }
 0x32b   :  { %1884 = vrot.lane.b32.xlu0 %v3535_v50, %s3260_s25 }
 0x32f   :  { %1896 = vrot.lane.b32.xlu0 %v3535_v50, %s3261_s9 }
 0x333   :  { %1880 = vrot.lane.b32.xlu0 %v3537_v53, %s3262_s28 }
 0x337   :  { %1908 = vrot.lane.b32.xlu0 %v3535_v50, %s3263_s15 }
 0x33b   :  { %1914 = vrot.lane.b32.xlu0 %v3535_v50, %s3264_s0 }
 0x33f   :  { %1920 = vrot.lane.b32.xlu0 %v3535_v50, %s3255_s17 }
 0x379   :  { %v448_v2 = vpop.permute.xlu0 %447 }
 0x37a   :  { %v453_v4 = vmul.f32 %v448_v2, %v437_v1  ;;  %v3047_v1 = vld [vmem:[%s4420_s10 + $0x8] sm:$0xff]  }
 0x37c   :  { %v3584_v7 = vadd.f32 %v453_v4, %v3535_v50 }
 0x37d   :  { %v450_v5 = vpop.permute.xlu0 %449 }
 0x37e   :  { %v454_v6 = vmul.f32 %v450_v5, %v438_v3  ;;  %v3048_v5 = vld [vmem:[%s4420_s10 + $0x10] sm:$0xff]  }
 0x380   :  { %v3587_v8 = vadd.f32 %v454_v6, %v3537_v53 }
 0x382   :  { %v3591_v9 = vpack.c.bf16 %v3587_v8, %v3584_v7 }
 0x384   :  { %1095 = vrot.lane.b32.xlu1 %v3591_v9, %s3262_s28  ;;  %2765 = vmatmul.mubr.msk.bf16.vlgmr.msra.gmra.mrb[4].mxu1 %vm478_vm4, %v3591_v9 }
 0x385   :  { %2784 = vmatprep.mubr.msk.bf16.mxu1 %vm3254_vm0, %v3253_v0  ;;  %2769 = vmatpush3.bf16.msra.mxu1 %v3028_v10  ;;  %v3049_v10 = vld [vmem:[%s4420_s10 + $0x18] sm:$0xff]  }
 0x386   :  { %2770 = vmatprep.subr.bf16.mxu1 %v3253_v0 }
 0x388   :  { %1945 = vrot.lane.b32.xlu1 %v3535_v50, %s3265_s6 }
 0x389   :  { %2771 = vmatpush3.bf16.msra.mxu1 %v3029_v11  ;;  %v3050_v11 = vld [vmem:[%s4420_s10 + $0x20] sm:$0xff]  }
 0x38a   :  { %2772 = vmatprep.subr.bf16.mxu1 %v3253_v0 }
 0x38c   :  { %1957 = vrot.lane.b32.xlu1 %v3535_v50, %s3266_s30 }
 0x38d   :  { %2773 = vmatpush3.bf16.msra.mxu1 %v3030_v12  ;;  %v3051_v12 = vld [vmem:[%s4420_s10 + $0x28] sm:$0xff]  }
 0x38e   :  { %2774 = vmatprep.subr.bf16.mxu1 %v3253_v0 }
 0x390   :  { %1947 = vrot.lane.b32.xlu1 %v3537_v53, %s3265_s6 }
 0x391   :  { %2775 = vmatpush3.bf16.msra.mxu1 %v3031_v13  ;;  %v3052_v13 = vld [vmem:[%s4420_s10 + $0x30] sm:$0xff]  }
 0x392   :  { %2776 = vmatprep.subr.bf16.mxu1 %v3253_v0 }
 0x394   :  { %1969 = vrot.lane.b32.xlu1 %v3535_v50, %s3259_s24 }
 0x395   :  { %2777 = vmatpush3.bf16.msra.mxu1 %v3032_v14  ;;  %v3053_v14 = vld [vmem:[%s4420_s10 + $0x38] sm:$0xff]  }
 0x396   :  { %2778 = vmatprep.subr.bf16.mxu1 %v3253_v0 }
 0x398   :  { %1959 = vrot.lane.b32.xlu1 %v3537_v53, %s3266_s30 }
 0x399   :  { %2779 = vmatpush3.bf16.msra.mxu1 %v3033_v15  ;;  %v3054_v15 = vld [vmem:[%s4422_s12] sm:$0xff]   ;;  %s4445_s12 = sld [smem:[#allocation16_spill]] }
 0x39a   :  { %2780 = vmatprep.subr.bf16.mxu1 %v3253_v0 }
 0x39c   :  { %1965 = vrot.lane.b32.xlu1 %v3537_v53, %s3257_s2 }
 0x39d   :  { %2781 = vmatpush3.bf16.msra.mxu1 %v3034_v16 }
 0x39e   :  { %2782 = vmatprep.subr.bf16.mxu1 %v3253_v0 }
 0x3a0   :  { %1977 = vrot.lane.b32.xlu1 %v3537_v53, %s3249_s27  ;;  %s3274_s27 = smov 92  }
 0x3a1   :  { %2783 = vmatpush3.bf16.msra.mxu1 %v3035_v17  ;;  %v3055_v17 = vld [vmem:[%s4421_s11] sm:$0xff]  }
 0x3a2   :  { %2808 = vmatprep.subr.bf16.mxu1 %v3253_v0 }
 0x3a4   :  { %1878 = vrot.lane.b32.xlu1 %v3535_v50, %s3262_s28 }
 0x3a8   :  { %1890 = vrot.lane.b32.xlu1 %v3535_v50, %s3267_s29 }
 0x3ac   :  { %1902 = vrot.lane.b32.xlu1 %v3535_v50, %s3268_s23 }
 0x3b0   :  { %1886 = vrot.lane.b32.xlu1 %v3537_v53, %s3260_s25 }
 0x3b4   :  { %1892 = vrot.lane.b32.xlu1 %v3537_v53, %s3267_s29 }
 0x3b8   :  { %1898 = vrot.lane.b32.xlu1 %v3537_v53, %s3261_s9  ;;  %s4468_s9 = sld [smem:[#allocation14_spill]] }
 0x3f6   :  { %v1096_v16 = vpop.permute.xlu1 %1095 }
 0x457   :  { %v520_v25 = vpop.f32.mrb[4].mxu1 }
 0x458   :  { %v521_v26 = vadd.f32 %v2480_v24, %v520_v25  ;;  %v2766_v27 = vpop.f32.mrb[5].mxu1 }
 0x459   :  { %v523_v28 = vpop.f32.mrb[6].mxu1 }
 0x45a   :  { %v527_v29 = vmul.f32 0.01, %v521_v26  ;;  %v524_v30 = vadd.f32 %v2480_v24, %v523_v28  ;;  %v2767_v31 = vpop.f32.mrb[7].mxu1  ;;  %v3062_v24 = vld [vmem:[%s4421_s11 + $0x38] sm:$0xff]  }
 0x45c   :  { %v528_v32 = vmul.f32 0.01, %v524_v30  ;;  %v529_v33 = vmax.f32 %v521_v26, %v527_v29  ;;  %v2506_v29 = vld [vmem:[%s4428_s18 + $0x7] ss:$0 sm:$0xff] }
 0x45e   :  { %v530_v34 = vmax.f32 %v524_v30, %v528_v32 }
 0x460   :  { %v548_v36 = vpack.c.bf16 %v530_v34, %v529_v33 }
 0x462   :  { %2785 = vmatmul.mubr.bf16.vlgmr.msra.gmra.mrb[8].mxu1 %v548_v36 }
 0x463   :  { %2809 = vmatpush3.bf16.msra.mxu1 %v3036_v35  ;;  %2812 = vmatprep.mubr.msk.bf16.mxu1 %vm3254_vm0, %v3253_v0 }
 0x464   :  { %2810 = vmatprep.subr.bf16.mxu1 %v3253_v0 }
 0x467   :  { %2811 = vmatpush3.bf16.msra.mxu1 %v781_v38  ;;  %v2524_v38 = vld [vmem:[%s4428_s18 + $0x9] ss:$0 sm:$0xff] }
 0x468   :  { %2836 = vmatprep.subr.bf16.mxu1 %v3253_v0 }
 0x46a   :  { %2813 = vmatmul.mubr.msk.bf16.vlgmr.msra.gmra.mrb[12].mxu1 %vm478_vm4, %v3591_v9 }
 0x46b   :  { %2852 = vmatprep.mubr.msk.bf16.mxu1 %vm3254_vm0, %v3253_v0  ;;  %2837 = vmatpush3.bf16.msra.mxu1 %v3055_v17 }
 0x46c   :  { %2838 = vmatprep.subr.bf16.mxu1 %v3253_v0 }
 0x46f   :  { %2839 = vmatpush3.bf16.msra.mxu1 %v3056_v18 }
 0x470   :  { %2840 = vmatprep.subr.bf16.mxu1 %v3253_v0 }
 0x473   :  { %2841 = vmatpush3.bf16.msra.mxu1 %v3057_v19 }
 0x474   :  { %2842 = vmatprep.subr.bf16.mxu1 %v3253_v0 }
 0x477   :  { %2843 = vmatpush3.bf16.msra.mxu1 %v3058_v20 }
 0x478   :  { %2844 = vmatprep.subr.bf16.mxu1 %v3253_v0 }
 0x47b   :  { %2845 = vmatpush3.bf16.msra.mxu1 %v3059_v21 }
 0x47c   :  { %2846 = vmatprep.subr.bf16.mxu1 %v3253_v0 }
 0x47f   :  { %2847 = vmatpush3.bf16.msra.mxu1 %v3060_v22 }
 0x480   :  { %2848 = vmatprep.subr.bf16.mxu1 %v3253_v0 }
 0x483   :  { %2849 = vmatpush3.bf16.msra.mxu1 %v3061_v23 }
 0x484   :  { %2850 = vmatprep.subr.bf16.mxu1 %v3253_v0 }
 0x487   :  { %2851 = vmatpush3.bf16.msra.mxu1 %v3062_v24 }
 0x488   :  { %2862 = vmatprep.subr.bf16.mxu1 %v3253_v0 }
 0x535   :  { %v637_v42 = vpop.f32.mrb[8].mxu1 }
 0x536   :  { %v638_v43 = vadd.f32 %v2484_v41, %v637_v42  ;;  %v2786_v44 = vpop.f32.mrb[9].mxu1  ;;  %v3063_v42 = vld [vmem:[%s4423_s13] sm:$0xff]  }
 0x537   :  { %v640_v45 = vpop.f32.mrb[10].mxu1 }
 0x538   :  { %v644_v46 = vmul.f32 0.01, %v638_v43  ;;  %v641_v47 = vadd.f32 %v2484_v41, %v640_v45  ;;  %v2787_v48 = vpop.f32.mrb[11].mxu1 }
 0x53a   :  { %v645_v49 = vmul.f32 0.01, %v641_v47  ;;  %v646_v52 = vmax.f32 %v638_v43, %v644_v46 }
 0x53c   :  { %v647_v54 = vmax.f32 %v641_v47, %v645_v49 }
 0x53d   :  { %v817_v55 = vpop.f32.mrb[12].mxu1 }
 0x53e   :  { %v665_v57 = vpack.c.bf16 %v647_v54, %v646_v52  ;;  %v818_v58 = vadd.f32 %v2502_v51, %v817_v55  ;;  %v2814_v59 = vpop.f32.mrb[13].mxu1 }
 0x53f   :  { %v820_v60 = vpop.f32.mrb[14].mxu1  ;;  %v3067_v59 = vld [vmem:[%s4423_s13 + $0x20] sm:$0xff]  }
 0x540   :  { %v824_v61 = vmul.f32 0.01, %v818_v58  ;;  %v821_v62 = vadd.f32 %v2502_v51, %v820_v60  ;;  %2805 = vmatmul.mubr.bf16.vlgmr.msra.gmra.mrb[8].mxu0 %v665_v57  ;;  %v2815_v63 = vpop.f32.mrb[15].mxu1  ;;  %v3064_v51 = vld [vmem:[%s4423_s13 + $0x8] sm:$0xff]  }
 0x541   :  { %2817 = vmatpush3.bf16.msra.mxu0 %v3046_v56  ;;  %2832 = vmatprep.mubr.msk.bf16.mxu0 %vm3254_vm0, %v3253_v0  ;;  %v3065_v56 = vld [vmem:[%s4423_s13 + $0x10] sm:$0xff]   ;;  %v3068_v60 = vld [vmem:[%s4423_s13 + $0x28] sm:$0xff]   ;;  %v1382_v63 = vld [vmem:[#allocation7] sm:$0xf] }
 0x542   :  { %v825_v2 = vmul.f32 0.01, %v821_v62  ;;  %2818 = vmatprep.subr.bf16.mxu0 %v3253_v0  ;;  %v826_v3 = vmax.f32 %v818_v58, %v824_v61  ;;  %v3066_v58 = vld [vmem:[%s4423_s13 + $0x18] sm:$0xff]   ;;  %v3069_v61 = vld [vmem:[%s4423_s13 + $0x30] sm:$0xff]  }
 0x544   :  { %v827_v4 = vmax.f32 %v821_v62, %v825_v2  ;;  %v3070_v62 = vld [vmem:[%s4423_s13 + $0x38] sm:$0xff]   ;;  %v3071_v2 = vld [vmem:[%s4424_s14] sm:$0xff]  }
 0x545   :  { %2819 = vmatpush3.bf16.msra.mxu0 %v3047_v1  ;;  %v1393_v1 = vsel %vm482_vm3, %v1382_v63, 0  ;;  %v3099_v63 = vld [vmem:[%s4445_s12 + $0x48] ss:$12 sps:$4 sm:$0xff]  }
 0x546   :  { %v845_v6 = vpack.c.bf16 %v827_v4, %v826_v3  ;;  %2820 = vmatprep.subr.bf16.mxu0 %v3253_v0  ;;  %v3072_v3 = vld [vmem:[%s4424_s14 + $0x8] sm:$0xff]   ;;  %v3073_v4 = vld [vmem:[%s4424_s14 + $0x10] sm:$0xff]  }
 0x549   :  { %2821 = vmatpush3.bf16.msra.mxu0 %v3048_v5  ;;  %v3075_v5 = vld [vmem:[%s4424_s14 + $0x20] sm:$0xff]  }
 0x54a   :  { %2822 = vmatprep.subr.bf16.mxu0 %v3253_v0 }
 0x54d   :  { %2823 = vmatpush3.bf16.msra.mxu0 %v3049_v10  ;;  %v3077_v10 = vld [vmem:[%s4424_s14 + $0x30] sm:$0xff]  }
 0x54e   :  { %2824 = vmatprep.subr.bf16.mxu0 %v3253_v0 }
 0x551   :  { %2825 = vmatpush3.bf16.msra.mxu0 %v3050_v11  ;;  %v3078_v11 = vld [vmem:[%s4424_s14 + $0x38] sm:$0xff]  }
 0x552   :  { %2826 = vmatprep.subr.bf16.mxu0 %v3253_v0 }
 0x555   :  { %2827 = vmatpush3.bf16.msra.mxu0 %v3051_v12 }
 0x556   :  { %2828 = vmatprep.subr.bf16.mxu0 %v3253_v0 }
 0x559   :  { %2829 = vmatpush3.bf16.msra.mxu0 %v3052_v13 }
 0x55a   :  { %2830 = vmatprep.subr.bf16.mxu0 %v3253_v0 }
 0x55d   :  { %2831 = vmatpush3.bf16.msra.mxu0 %v3053_v14 }
 0x55e   :  { %2856 = vmatprep.subr.bf16.mxu0 %v3253_v0 }
 0x560   :  { %2833 = vmatmul.mubr.bf16.vlgmr.msra.gmra.mrb[12].mxu0 %v845_v6  ;;  %v3076_v6 = vld [vmem:[%s4424_s14 + $0x28] sm:$0xff]  }
 0x561   :  { %2857 = vmatpush3.bf16.msra.mxu0 %v3054_v15  ;;  %2858 = vmatprep.mubr.msk.bf16.mxu0 %vm3254_vm0, %v3253_v0 }
 0x562   :  { %2882 = vmatprep.subr.bf16.mxu0 %v3253_v0 }
 0x568   :  { %2859 = vmatmul.mubr.msk.bf16.vlgmr.msra.gmra.mrb[16].mxu0 %vm1103_vm5, %v1096_v16  ;;  %v2527_v16 = vld [vmem:[%s4428_s18 + $0xa] ss:$0 sm:$0xff] }
 0x569   :  { %2898 = vmatprep.mubr.msk.bf16.mxu0 %vm3254_vm0, %v3253_v0  ;;  %2883 = vmatpush3.bf16.msra.mxu0 %v3071_v2  ;;  %v3106_v2 = vld [vmem:[%s4445_s12 + $0x68] ss:$12 sps:$4 sm:$0xff]  }
 0x56a   :  { %2884 = vmatprep.subr.bf16.mxu0 %v3253_v0 }
 0x56d   :  { %2885 = vmatpush3.bf16.msra.mxu0 %v3072_v3  ;;  %v3103_v3 = vld [vmem:[%s4445_s12 + $0x60] ss:$12 sps:$4 sm:$0xff]  }
 0x56e   :  { %2886 = vmatprep.subr.bf16.mxu0 %v3253_v0 }
 0x571   :  { %2887 = vmatpush3.bf16.msra.mxu0 %v3073_v4  ;;  %v3109_v4 = vld [vmem:[%s4445_s12 + $0x7c] ss:$12 sps:$4 sm:$0xff]  }
 0x572   :  { %2888 = vmatprep.subr.bf16.mxu0 %v3253_v0 }
 0x613   :  { %v3778_v25 = vpop.f32.mrb[8].mxu0 }
 0x614   :  { %v2806_v26 = vpop.f32.mrb[9].mxu0 }
 0x615   :  { %v3780_v27 = vpop.f32.mrb[10].mxu0  ;;  %v2545_v26 = vld [vmem:[%s4428_s18 + $0xc] ss:$0 sm:$0xff] }
 0x616   :  { %v2807_v28 = vpop.f32.mrb[11].mxu0 }
 0x633   :  { %v934_v30 = vpop.f32.mrb[12].mxu0 }
 0x634   :  { %v935_v31 = vadd.f32 %v2506_v29, %v934_v30  ;;  %v2834_v32 = vpop.f32.mrb[13].mxu0 }
 0x635   :  { %v937_v33 = vpop.f32.mrb[14].mxu0 }
 0x636   :  { %v941_v34 = vmul.f32 0.01, %v935_v31  ;;  %v938_v35 = vadd.f32 %v2506_v29, %v937_v33  ;;  %v2835_v36 = vpop.f32.mrb[15].mxu0 }
 0x638   :  { %v942_v37 = vmul.f32 0.01, %v938_v35  ;;  %v943_v39 = vmax.f32 %v935_v31, %v941_v34  ;;  %v3079_v31 = vld [vmem:[%s4426_s16] sm:$0xff]  }
 0x63a   :  { %v944_v40 = vmax.f32 %v938_v35, %v942_v37 }
 0x63b   :  { %v1141_v41 = vpop.f32.mrb[16].mxu0 }
 0x63c   :  { %v962_v43 = vpack.c.bf16 %v944_v40, %v943_v39  ;;  %v1142_v44 = vadd.f32 %v2524_v38, %v1141_v41  ;;  %v2860_v45 = vpop.f32.mrb[17].mxu0  ;;  %v3080_v39 = vld [vmem:[%s4426_s16 + $0x8] sm:$0xff]  }
 0x63d   :  { %v1144_v46 = vpop.f32.mrb[18].mxu0  ;;  %v3082_v45 = vld [vmem:[%s4426_s16 + $0x18] sm:$0xff]  }
 0x63e   :  { %v1148_v47 = vmul.f32 0.01, %v1142_v44  ;;  %v1145_v48 = vadd.f32 %v2524_v38, %v1144_v46  ;;  %2853 = vmatmul.mubr.bf16.vlgmr.msra.gmra.mrb[16].mxu1 %v962_v43  ;;  %v2861_v49 = vpop.f32.mrb[19].mxu0  ;;  %v3081_v43 = vld [vmem:[%s4426_s16 + $0x10] sm:$0xff]   ;;  %v3083_v46 = vld [vmem:[%s4426_s16 + $0x20] sm:$0xff]  }
 0x63f   :  { %2863 = vmatpush3.bf16.msra.mxu1 %v3063_v42  ;;  %2878 = vmatprep.mubr.msk.bf16.mxu1 %vm3254_vm0, %v3253_v0  ;;  %v3086_v49 = vld [vmem:[%s4426_s16 + $0x38] sm:$0xff]  }
 0x640   :  { %v1149_v52 = vmul.f32 0.01, %v1145_v48  ;;  %2864 = vmatprep.subr.bf16.mxu1 %v3253_v0  ;;  %v1150_v54 = vmax.f32 %v1142_v44, %v1148_v47  ;;  %v3084_v47 = vld [vmem:[%s4426_s16 + $0x28] sm:$0xff]  }
 0x642   :  { %v1151_v55 = vmax.f32 %v1145_v48, %v1149_v52  ;;  %v3085_v48 = vld [vmem:[%s4426_s16 + $0x30] sm:$0xff]  }
 0x643   :  { %2865 = vmatpush3.bf16.msra.mxu1 %v3064_v51  ;;  %v3087_v51 = vld [vmem:[%s4445_s12] ss:$12 sps:$4 sm:$0xff]   ;;  %v3089_v52 = vld [vmem:[%s4445_s12 + $0x4] ss:$12 sps:$4 sm:$0xff]  }
 0x644   :  { %v1169_v57 = vpack.c.bf16 %v1151_v55, %v1150_v54  ;;  %2866 = vmatprep.subr.bf16.mxu1 %v3253_v0  ;;  %v3090_v54 = vld [vmem:[%s4445_s12 + $0x8] ss:$12 sps:$4 sm:$0xff]  }
 0x645   :  { %v3093_v55 = vld [vmem:[%s4445_s12 + $0x1c] ss:$12 sps:$4 sm:$0xff]  }
 0x647   :  { %2867 = vmatpush3.bf16.msra.mxu1 %v3065_v56  ;;  %v3094_v56 = vld [vmem:[%s4445_s12 + $0x20] ss:$12 sps:$4 sm:$0xff]  }
 0x648   :  { %2868 = vmatprep.subr.bf16.mxu1 %v3253_v0 }
 0x64b   :  { %2869 = vmatpush3.bf16.msra.mxu1 %v3066_v58  ;;  %v3097_v58 = vld [vmem:[%s4445_s12 + $0x34] ss:$12 sps:$4 sm:$0xff]  }
 0x64c   :  { %2870 = vmatprep.subr.bf16.mxu1 %v3253_v0 }
 0x64f   :  { %2871 = vmatpush3.bf16.msra.mxu1 %v3067_v59  ;;  %v3098_v59 = vld [vmem:[%s4445_s12 + $0x38] ss:$12 sps:$4 sm:$0xff]  }
 0x650   :  { %2872 = vmatprep.subr.bf16.mxu1 %v3253_v0 }
 0x653   :  { %2873 = vmatpush3.bf16.msra.mxu1 %v3068_v60  ;;  %v3095_v60 = vld [vmem:[%s4445_s12 + $0x30] ss:$12 sps:$4 sm:$0xff]  }
 0x654   :  { %2874 = vmatprep.subr.bf16.mxu1 %v3253_v0 }
 0x657   :  { %2875 = vmatpush3.bf16.msra.mxu1 %v3069_v61  ;;  %v3101_v61 = vld [vmem:[%s4445_s12 + $0x4c] ss:$12 sps:$4 sm:$0xff]  }
 0x658   :  { %2876 = vmatprep.subr.bf16.mxu1 %v3253_v0 }
 0x65b   :  { %2877 = vmatpush3.bf16.msra.mxu1 %v3070_v62  ;;  %v3102_v62 = vld [vmem:[%s4445_s12 + $0x50] ss:$12 sps:$4 sm:$0xff]  }
 0x65c   :  { %2902 = vmatprep.subr.bf16.mxu1 %v3253_v0 }
 0x65e   :  { %2879 = vmatmul.mubr.bf16.vlgmr.msra.gmra.mrb[20].mxu1 %v1169_v57  ;;  %v3091_v57 = vld [vmem:[%s4445_s12 + $0x18] ss:$12 sps:$4 sm:$0xff]  }
 0x65f   :  { %2903 = vmatpush3.bf16.msra.mxu1 %v1393_v1  ;;  %2904 = vmatprep.mubr.msk.bf16.mxu1 %vm3254_vm0, %v3253_v0  ;;  %v3105_v1 = vld [vmem:[%s4445_s12 + $0x64] ss:$12 sps:$4 sm:$0xff]  }
 0x660   :  { %1735 = vmatprep.subr.bf16.mxu1 %v3089_v52 }
 0x666   :  { %2905 = vmatmul.mubr.msk.bf16.vlgmr.msra.gmra.mrb[24].mxu1 %vm4434_vm6, %v3591_v9  ;;  %v3074_v9 = vld [vmem:[%s4424_s14 + $0x18] sm:$0xff]   ;;  %s3273_s14 = smov 82  }
 0x667   :  { %2889 = vmatpush3.bf16.msra.mxu0 %v3074_v9  ;;  %1736 = vmatpush1.bf16.msra.mxu1 %v3087_v51  ;;  %v3107_v9 = vld [vmem:[%s4445_s12 + $0x78] ss:$12 sps:$4 sm:$0xff]  }
 0x668   :  { %2890 = vmatprep.subr.bf16.mxu0 %v3253_v0  ;;  %1737 = vmatprep.subr.bf16.mxu1 %v3093_v55 }
 0x66b   :  { %2891 = vmatpush3.bf16.msra.mxu0 %v3075_v5  ;;  %1738 = vmatpush1.bf16.msra.mxu1 %v3091_v57  ;;  %v3110_v5 = vld [vmem:[%s4445_s12 + $0x80] ss:$12 sps:$4 sm:$0xff]  }
 0x66c   :  { %2892 = vmatprep.subr.bf16.mxu0 %v3253_v0  ;;  %1739 = vmatprep.subr.bf16.mxu1 %v3097_v58 }
 0x66f   :  { %2893 = vmatpush3.bf16.msra.mxu0 %v3076_v6  ;;  %1740 = vmatpush1.bf16.msra.mxu1 %v3095_v60  ;;  %v3113_v6 = vld [vmem:[%s4445_s12 + $0x94] ss:$12 sps:$4 sm:$0xff]  }
 0x670   :  { %2894 = vmatprep.subr.bf16.mxu0 %v3253_v0  ;;  %1741 = vmatprep.subr.bf16.mxu1 %v3101_v61 }
 0x673   :  { %2895 = vmatpush3.bf16.msra.mxu0 %v3077_v10  ;;  %1742 = vmatpush1.bf16.msra.mxu1 %v3099_v63  ;;  %v3111_v10 = vld [vmem:[%s4445_s12 + $0x90] ss:$12 sps:$4 sm:$0xff]  }
 0x674   :  { %2896 = vmatprep.subr.bf16.mxu0 %v3253_v0  ;;  %1743 = vmatprep.subr.bf16.mxu1 %v3105_v1 }
 0x677   :  { %2897 = vmatpush3.bf16.msra.mxu0 %v3078_v11  ;;  %1744 = vmatpush1.bf16.msra.mxu1 %v3103_v3  ;;  %v3114_v11 = vld [vmem:[%s4445_s12 + $0x98] ss:$12 sps:$4 sm:$0xff]  }
 0x678   :  { %2908 = vmatprep.subr.bf16.mxu0 %v3253_v0  ;;  %1745 = vmatprep.subr.bf16.mxu1 %v3109_v4 }
 0x67b   :  { %1746 = vmatpush1.bf16.msra.mxu1 %v3107_v9 }
 0x67c   :  { %1747 = vmatprep.subr.bf16.mxu1 %v3113_v6 }
 0x67f   :  { %1748 = vmatpush1.bf16.msra.mxu1 %v3111_v10 }
 0x711   :  { %v3859_v12 = vpop.f32.mrb[16].mxu1 }
 0x712   :  { %v2854_v13 = vpop.f32.mrb[17].mxu1 }
 0x713   :  { %v3861_v14 = vpop.f32.mrb[18].mxu1  ;;  %v3117_v13 = vld [vmem:[%s4445_s12 + $0xac] ss:$12 sps:$4 sm:$0xff]  }
 0x714   :  { %v2855_v15 = vpop.f32.mrb[19].mxu1  ;;  %1749 = vmatprep.subr.bf16.mxu1 %v3117_v13 }
 0x715   :  { %v3115_v15 = vld [vmem:[%s4445_s12 + $0xa8] ss:$12 sps:$4 sm:$0xff]  }
 0x716   :  { %1750 = vmatpush1.bf16.msra.mxu1 %v3115_v15 }
 0x731   :  { %v1258_v17 = vpop.f32.mrb[20].mxu1 }
 0x732   :  { %v1259_v18 = vadd.f32 %v2527_v16, %v1258_v17  ;;  %v2880_v19 = vpop.f32.mrb[21].mxu1  ;;  %v3269_v17 = vmov 0  }
 0x733   :  { %v1261_v20 = vpop.f32.mrb[22].mxu1  ;;  %1767 = vmatprep.mubr.bf16.mxu1 %v3269_v17 }
 0x734   :  { %v1265_v21 = vmul.f32 0.01, %v1259_v18  ;;  %v1262_v22 = vadd.f32 %v2527_v16, %v1261_v20  ;;  %v2881_v23 = vpop.f32.mrb[23].mxu1  ;;  %v3118_v16 = vld [vmem:[%s4445_s12 + $0xb0] ss:$12 sps:$4 sm:$0xff]  }
 0x736   :  { %v1266_v24 = vmul.f32 0.01, %v1262_v22  ;;  %v1267_v28 = vmax.f32 %v1259_v18, %v1265_v21 }
 0x738   :  { %v1268_v29 = vmax.f32 %v1262_v22, %v1266_v24  ;;  %v2547_v22 = vld [vmem:[%s4428_s18 + $0xd] ss:$0 sm:$0xff] }
 0x739   :  { %v1429_v30 = vpop.f32.mrb[24].mxu1 }
 0x73a   :  { %v1286_v32 = vpack.c.bf16 %v1268_v29, %v1267_v28  ;;  %v1430_v33 = vadd.f32 %v2545_v26, %v1429_v30  ;;  %v2906_v34 = vpop.f32.mrb[25].mxu1 }
 0x73b   :  { %v1432_v35 = vpop.f32.mrb[26].mxu1 }
 0x73c   :  { %v1436_v36 = vmul.f32 0.01, %v1430_v33  ;;  %v1433_v37 = vadd.f32 %v2545_v26, %v1432_v35  ;;  %2899 = vmatmul.mubr.bf16.vlgmr.msra.gmra.mrb[20].mxu0 %v1286_v32  ;;  %v2907_v38 = vpop.f32.mrb[27].mxu1 }
 0x73d   :  { %2909 = vmatpush3.bf16.msra.mxu0 %v3079_v31  ;;  %2924 = vmatprep.mubr.msk.bf16.mxu0 %vm3254_vm0, %v3253_v0 }
 0x73e   :  { %v1437_v40 = vmul.f32 0.01, %v1433_v37  ;;  %2910 = vmatprep.subr.bf16.mxu0 %v3253_v0  ;;  %v1438_v41 = vmax.f32 %v1430_v33, %v1436_v36  ;;  %v1592_v36 = vlaneseq }
 0x740   :  { %v1439_v42 = vmax.f32 %v1433_v37, %v1437_v40  ;;  %v1946_v37 = vpop.permute.xlu1 %1945  ;;  %v3992_v38 = vshrl.u32 %v1592_v36, 7 }
 0x741   :  { %2911 = vmatpush3.bf16.msra.mxu0 %v3080_v39  ;;  %v1952_v39 = vpop.permute.xlu0 %1951 }
 0x742   :  { %v1457_v44 = vpack.c.bf16 %v1439_v42, %v1438_v41  ;;  %2912 = vmatprep.subr.bf16.mxu0 %v3253_v0  ;;  %v1602_v41 = vsub.s32 2, %v3992_v38  ;;  %v3998_v42 = vld [vmem:[%s4428_s18 + $0xe] sm:$0x7]  ;;  %v1987_v13 = vsel %vm1103_vm5, %v1946_v37, %v1952_v39 }
 0x744   :  { %v1958_v40 = vpop.permute.xlu1 %1957 }
 0x745   :  { %2913 = vmatpush3.bf16.msra.mxu0 %v3081_v43  ;;  %v1598_v43 = vsub.s32 1, %v3992_v38 }
 0x746   :  { %2914 = vmatprep.subr.bf16.mxu0 %v3253_v0 }
 0x749   :  { %2915 = vmatpush3.bf16.msra.mxu0 %v3082_v45  ;;  %v1599_v45 = vrot.slane %v3998_v42, %v1598_v43 }
 0x74a   :  { %2916 = vmatprep.subr.bf16.mxu0 %v3253_v0 }
 0x74d   :  { %2917 = vmatpush3.bf16.msra.mxu0 %v3083_v46  ;;  %v1964_v46 = vpop.permute.xlu0 %1963 }
 0x74e   :  { %2918 = vmatprep.subr.bf16.mxu0 %v3253_v0 }
 0x751   :  { %2919 = vmatpush3.bf16.msra.mxu0 %v3084_v47  ;;  %v1948_v47 = vpop.permute.xlu1 %1947  ;;  %v1954_v3 = vpop.permute.xlu0 %1953 }
 0x752   :  { %2920 = vmatprep.subr.bf16.mxu0 %v3253_v0 }
 0x755   :  { %2921 = vmatpush3.bf16.msra.mxu0 %v3085_v48 }
 0x756   :  { %2922 = vmatprep.subr.bf16.mxu0 %v3253_v0 }
 0x759   :  { %2923 = vmatpush3.bf16.msra.mxu0 %v3086_v49 }
 0x75a   :  { %2928 = vmatprep.subr.bf16.mxu0 %v3253_v0 }
 0x75c   :  { %2925 = vmatmul.mubr.bf16.vlgmr.msra.gmra.mrb[24].mxu0 %v1457_v44  ;;  %v1603_v44 = vrot.slane %v3998_v42, %v1602_v41 }
 0x75d   :  { %2944 = vmatprep.mubr.msk.bf16.mxu0 %vm3254_vm0, %v3253_v0  ;;  %2929 = vmatpush3.bf16.msra.mxu0 %v3090_v54 }
 0x75e   :  { %2930 = vmatprep.subr.bf16.mxu0 %v3253_v0 }
 0x761   :  { %2931 = vmatpush3.bf16.msra.mxu0 %v3094_v56 }
 0x762   :  { %2932 = vmatprep.subr.bf16.mxu0 %v3253_v0 }
 0x765   :  { %2933 = vmatpush3.bf16.msra.mxu0 %v3098_v59 }
 0x766   :  { %2934 = vmatprep.subr.bf16.mxu0 %v3253_v0 }
 0x769   :  { %2935 = vmatpush3.bf16.msra.mxu0 %v3102_v62 }
 0x76a   :  { %2936 = vmatprep.subr.bf16.mxu0 %v3253_v0 }
 0x76d   :  { %2937 = vmatpush3.bf16.msra.mxu0 %v3106_v2 }
 0x76e   :  { %2938 = vmatprep.subr.bf16.mxu0 %v3253_v0 }
 0x771   :  { %2939 = vmatpush3.bf16.msra.mxu0 %v3110_v5  ;;  %v1970_v5 = vpop.permute.xlu1 %1969 }
 0x772   :  { %2940 = vmatprep.subr.bf16.mxu0 %v3253_v0 }
 0x775   :  { %2941 = vmatpush3.bf16.msra.mxu0 %v3114_v11  ;;  %v1976_v11 = vpop.permute.xlu0 %1975  ;;  %v1960_v15 = vpop.permute.xlu1 %1959 }
 0x776   :  { %2942 = vmatprep.subr.bf16.mxu0 %v3253_v0 }
 0x779   :  { %2943 = vmatpush3.bf16.msra.mxu0 %v3118_v16  ;;  %v1989_v16 = vsel %vm1928_vm7, %v1987_v13, %v3535_v50 }
 0x80f   :  { %v3984_v18 = vpop.f32.mrb[20].mxu0 }
 0x810   :  { %v2900_v19 = vpop.f32.mrb[21].mxu0 }
 0x811   :  { %v3986_v20 = vpop.f32.mrb[22].mxu0  ;;  %v1991_v19 = vsel %vm1931_vm2, %v1989_v16, %v1958_v40 }
 0x812   :  { %v2901_v21 = vpop.f32.mrb[23].mxu0 }
 0x82f   :  { %v1546_v23 = vpop.f32.mrb[24].mxu0 }
 0x830   :  { %v1547_v24 = vadd.f32 %v2547_v22, %v1546_v23  ;;  %v2926_v26 = vpop.f32.mrb[25].mxu0  ;;  %v4040_v23 = vsel %vm1103_vm5, %v1948_v47, %v1954_v3 }
 0x831   :  { %v1549_v28 = vpop.f32.mrb[26].mxu0  ;;  %v1993_v26 = vsel %vm4435_vm1, %v1991_v19, %v1964_v46 }
 0x832   :  { %v1553_v29 = vmul.f32 0.01, %v1547_v24  ;;  %v1550_v30 = vadd.f32 %v2547_v22, %v1549_v28  ;;  %v2927_v31 = vpop.f32.mrb[27].mxu0  ;;  %v1982_v22 = vpop.permute.xlu0 %1981  ;;  %v1995_v28 = vsel %vm1936_vm8, %v1993_v26, %v1970_v5 }
 0x834   :  { %v1554_v32 = vmul.f32 0.01, %v1550_v30  ;;  %v1555_v33 = vmax.f32 %v1547_v24, %v1553_v29  ;;  %v1966_v24 = vpop.permute.xlu1 %1965 }
 0x836   :  { %v1556_v34 = vmax.f32 %v1550_v30, %v1554_v32  ;;  %v1990_v30 = vsel %vm1928_vm7, %v4040_v23, %v3537_v53 }
 0x837   :  { %v1992_v32 = vsel %vm1931_vm2, %v1990_v30, %v1960_v15 }
 0x838   :  { %v1590_v35 = vpack.c.bf16 %v1556_v34, %v1555_v33  ;;  %v1972_v33 = vpop.permute.xlu0 %1971  ;;  %v1994_v34 = vsel %vm4435_vm1, %v1992_v32, %v1966_v24  ;;  %v1978_v37 = vpop.permute.xlu1 %1977 }
 0x839   :  { %v1996_v39 = vsel %vm1936_vm8, %v1994_v34, %v1972_v33 }
 0x83a   :  { %1768 = vmatmul.mubr.bf16.vlgmr.msra.gmra.mrb[28].mxu1 %v1590_v35  ;;  %2945 = vmatmul.mubr.bf16.vlgmr.msra.gmra.mrb[28].mxu0 %v1590_v35  ;;  %v1997_v35 = vsel %vm4436_vm9, %v1995_v28, %v1976_v11  ;;  %v1998_v41 = vsel %vm4436_vm9, %v1996_v39, %v1978_v37 }
 0x83b   :  { %v1999_v40 = vsel %vm1942_vm10, %v1997_v35, %v1982_v22 }
 0x83c   :  { %v1984_v43 = vpop.permute.xlu0 %1983  ;;  %v1879_v46 = vpop.permute.xlu1 %1878 }
 0x90d   :  { %v4003_v48 = vpop.f32.mrb[28].mxu1  ;;  %v1812_v49 = vpop.f32.mrb[28].mxu0 }
 0x90e   :  { %v4005_v51 = vadd.f32 %v1812_v49, %v1603_v44  ;;  %v1771_v52 = vpop.f32.mrb[29].mxu1  ;;  %v2946_v54 = vpop.f32.mrb[29].mxu0 }
 0x90f   :  { %v4007_v55 = vadd.f32 %v1771_v52, %v1599_v45  ;;  %v4009_v56 = vpop.f32.mrb[30].mxu1  ;;  %v1815_v57 = vpop.f32.mrb[30].mxu0 }
 0x910   :  { %v2088_v58 = vsub.f32 0.0, %v4005_v51  ;;  %v4012_v59 = vadd.f32 %v1815_v57, %v1603_v44  ;;  %v1775_v60 = vpop.f32.mrb[31].mxu1  ;;  %2037 = vrot.lane.b32.xlu0 %v4005_v51, %s3265_s6  ;;  %v2947_v61 = vpop.f32.mrb[31].mxu0  ;;  %v2000_v44 = vsel %vm1942_vm10, %v1998_v41, %v1984_v43 }
 0x911   :  { %v2087_v62 = vsub.f32 0.0, %v4007_v55  ;;  %v4017_v63 = vadd.f32 %v1775_v60, %v1599_v45  ;;  %2035 = vrot.lane.b32.xlu1 %v4007_v55, %s3265_s6  ;;  %v1885_v45 = vpop.permute.xlu0 %1884  ;;  %v1891_v49 = vpop.permute.xlu1 %1890 }
 0x912   :  { %v2093_v1 = vmul.f32 1.442695, %v2088_v58  ;;  %v2090_v2 = vsub.f32 0.0, %v4012_v59 }
 0x913   :  { %v2091_v4 = vmul.f32 1.442695, %v2087_v62  ;;  %v2089_v9 = vsub.f32 0.0, %v4017_v63 }
 0x914   :  { %3123 = vpow2.f32 %v2093_v1  ;;  %2041 = vrot.lane.b32.xlu0 %v4012_v59, %s3265_s6  ;;  %v2097_v6 = vmul.f32 1.442695, %v2090_v2  ;;  %v1926_v2 = vsel %vm1103_vm5, %v1879_v46, %v1885_v45 }
 0x915   :  { %3125 = vpow2.f32 %v2091_v4  ;;  %2039 = vrot.lane.b32.xlu1 %v4017_v63, %s3265_s6  ;;  %v2095_v10 = vmul.f32 1.442695, %v2089_v9  ;;  %v1897_v47 = vpop.permute.xlu0 %1896  ;;  %v1903_v54 = vpop.permute.xlu1 %1902  ;;  %v1929_v3 = vsel %vm1928_vm7, %v1926_v2, %v1891_v49  ;;  %v1594_v9 = vsub.s32 0, %v3992_v38 }
 0x916   :  { %3127 = vpow2.f32 %v2097_v6  ;;  %v2002_v39 = vsub.f32 %v1926_v2, %v4007_v55 }
 0x917   :  { %3129 = vpow2.f32 %v2095_v10  ;;  %v1932_v10 = vsel %vm1931_vm2, %v1929_v3, %v1897_v47 }
 0x918   :  { %1910 = vrot.lane.b32.xlu0 %v3537_v53, %s3263_s15  ;;  %v1934_v15 = vsel %vm4435_vm1, %v1932_v10, %v1903_v54  ;;  %v2084_v47 = vmul.f32 %v2002_v39, %v2002_v39 }
 0x919   :  { %1904 = vrot.lane.b32.xlu1 %v3537_v53, %s3268_s23  ;;  %v1881_v52 = vpop.permute.xlu0 %1880  ;;  %v1887_v58 = vpop.permute.xlu1 %1886 }
 0x91c   :  { %1922 = vrot.lane.b32.xlu0 %v3537_v53, %s3255_s17 }
 0x91d   :  { %1916 = vrot.lane.b32.xlu1 %v3537_v53, %s3264_s0  ;;  %v1909_v57 = vpop.permute.xlu0 %1908  ;;  %v1893_v61 = vpop.permute.xlu1 %1892 }
 0x91e   :  { %v3124_v17 = vpop.eup %3123  ;;  %v1937_v28 = vsel %vm1936_vm8, %v1934_v15, %v1909_v57 }
 0x91f   :  { %v3126_v21 = vpop.eup %3125 }
 0x920   :  { %2105 = vrot.lane.b32.xlu0 %v3124_v17, %s3265_s6  ;;  %v3128_v29 = vpop.eup %3127 }
 0x921   :  { %2103 = vrot.lane.b32.xlu1 %v3126_v21, %s3265_s6  ;;  %v3130_v31 = vpop.eup %3129  ;;  %v1915_v60 = vpop.permute.xlu0 %1914  ;;  %v1595_v21 = vrot.slane %v3998_v42, %v1594_v9 }
 0x922   :  { %v1899_v1 = vpop.permute.xlu1 %1898  ;;  %v1940_v33 = vsel %vm4436_vm9, %v1937_v28, %v1915_v60  ;;  %v2150_v28 = vadd.s32 16, %v3992_v38 }
 0x923   :  { %v4075_v32 = vadd.f32 %v4003_v48, %v1595_v21  ;;  %v4091_v2 = vadd.f32 %v4009_v56, %v1595_v21  ;;  %v3270_v21 = vmov 0.0|0.0  }
 0x924   :  { %2109 = vrot.lane.b32.xlu0 %v3128_v29, %s3265_s6  ;;  %2948 = vmatprep.subr.bf16.mxu1 %v3270_v21 }
 0x925   :  { %2107 = vrot.lane.b32.xlu1 %v3130_v31, %s3265_s6  ;;  %v1921_v62 = vpop.permute.xlu0 %1920  ;;  %v1927_v31 = vsel %vm1103_vm5, %v1881_v52, %v1887_v58 }
 0x926   :  { %v1930_v35 = vsel %vm1928_vm7, %v1927_v31, %v1893_v61  ;;  %v2004_v3 = vsub.f32 %v1927_v31, %v4017_v63  ;;  %v2154_v31 = vadd.s32 48, %v3992_v38 }
 0x928   :  { %2015 = vrot.lane.b32.xlu0 %v1987_v13, %s3257_s2  ;;  %v2086_v10 = vmul.f32 %v2004_v3, %v2004_v3 }
 0x929   :  { %2013 = vrot.lane.b32.xlu1 %v1999_v40, %s3257_s2 }
 0x92c   :  { %2019 = vrot.lane.b32.xlu0 %v4040_v23, %s3257_s2 }
 0x92d   :  { %2017 = vrot.lane.b32.xlu1 %v2000_v44, %s3257_s2 }
 0x982   :  { %v2038_v4 = vpop.permute.xlu0 %2037 }
 0x983   :  { %v2050_v5 = vsub.f32 %v1987_v13, %v2038_v4  ;;  %v2036_v6 = vpop.permute.xlu1 %2035 }
 0x984   :  { %v2043_v11 = vsel %vm4436_vm9, %v2036_v6, %v2038_v4 }
 0x985   :  { %v2055_v16 = vmul.f32 1.442695, %v2050_v5  ;;  %v2049_v17 = vsub.f32 %v1999_v40, %v2043_v11  ;;  %v1943_v40 = vsel %vm1942_vm10, %v1940_v33, %v1921_v62  ;;  %v3271_v33 = vmov 1.0|1.0  }
 0x986   :  { %v2042_v19 = vpop.permute.xlu0 %2041 }
 0x987   :  { %3131 = vpow2.f32 %v2055_v16  ;;  %v2053_v22 = vmul.f32 1.442695, %v2049_v17  ;;  %v2052_v24 = vsub.f32 %v4040_v23, %v2042_v19  ;;  %v2040_v26 = vpop.permute.xlu1 %2039  ;;  %v1933_v23 = vsel %vm1931_vm2, %v1930_v35, %v1899_v1 }
 0x988   :  { %v2044_v13 = vsel %vm4436_vm9, %v2040_v26, %v2042_v19  ;;  %v2169_v19 = vand.u32 127, %v1592_v36  ;;  %v2152_v36 = vadd.s32 32, %v3992_v38 }
 0x989   :  { %3133 = vpow2.f32 %v2053_v22  ;;  %v2051_v29 = vsub.f32 %v2000_v44, %v2044_v13  ;;  %v2059_v42 = vmul.f32 1.442695, %v2052_v24  ;;  %v2001_v44 = vsub.f32 %v1943_v40, %v4075_v32 }
 0x98a   :  { %v1911_v30 = vpop.permute.xlu0 %1910  ;;  %v2149_v22 = vadd.s32 8, %v3992_v38  ;;  %v4105_v24 = vmul.u32 16, %v2169_v19  ;;  %v2191_v26 = vadd.s32 1, %v2169_v19  ;;  %v2159_v40 = vadd.s32 88, %v3992_v38 }
 0x98b   :  { %v1905_v34 = vpop.permute.xlu1 %1904  ;;  %v2057_v37 = vmul.f32 1.442695, %v2051_v29  ;;  %3135 = vpow2.f32 %v2059_v42  ;;  %v2083_v57 = vmul.f32 %v2001_v44, %v2001_v44  ;;  %v2151_v29 = vadd.s32 24, %v3992_v38 }
 0x98c   :  { %v1935_v41 = vsel %vm4435_vm1, %v1933_v23, %v1905_v34  ;;  %vm2171_vm11 = vcmp.ge.s32.totalorder %v3992_v38, %v4105_v24  ;;  %v4110_v13 = vmul.u32 16, %v2191_v26  ;;  %vm2172_vm12 = vcmp.ge.s32.totalorder %v2149_v22, %v4105_v24 }
 0x98d   :  { %3137 = vpow2.f32 %v2057_v37  ;;  %v1938_v46 = vsel %vm1936_vm8, %v1935_v41, %v1911_v30  ;;  %vm2173_vm0 = vcmp.ge.s32.totalorder %v2150_v28, %v4105_v24  ;;  %v2153_v30 = vadd.s32 40, %v3992_v38 }
 0x98e   :  { %v1923_v43 = vpop.permute.xlu0 %1922  ;;  %vm2193_vm13 = vcmp.lt.s32.totalorder %v3992_v38, %v4110_v13  ;;  %vm2194_vm14 = vcmp.lt.s32.totalorder %v2149_v22, %v4110_v13  ;;  %vm2195_vm2 = vcmp.lt.s32.totalorder %v2150_v28, %v4110_v13  ;;  %vm2174_vm4 = vcmp.ge.s32.totalorder %v2151_v29, %v4105_v24 }
 0x98f   :  { %v1917_v48 = vpop.permute.xlu1 %1916  ;;  %vm2213_vm15 = vmand %vm2171_vm11, %vm2193_vm13  ;;  %vm2196_vm5 = vcmp.lt.s32.totalorder %v2151_v29, %v4110_v13  ;;  %vm2175_vm11 = vcmp.ge.s32.totalorder %v2152_v36, %v4105_v24  ;;  %vm2197_vm13 = vcmp.lt.s32.totalorder %v2152_v36, %v4110_v13  ;;  %v2155_v42 = vadd.s32 56, %v3992_v38 }
 0x990   :  { %v1941_v49 = vsel %vm4436_vm9, %v1938_v46, %v1917_v48  ;;  %vm2214_vm3 = vmand %vm2172_vm12, %vm2194_vm14  ;;  %vm2176_vm14 = vcmp.ge.s32.totalorder %v2153_v30, %v4105_v24  ;;  %vm2198_vm6 = vcmp.lt.s32.totalorder %v2153_v30, %v4110_v13  ;;  %v2156_v34 = vadd.s32 64, %v3992_v38 }
 0x991   :  { %v3132_v45 = vpop.eup %3131  ;;  %v1944_v62 = vsel %vm1942_vm10, %v1941_v49, %v1923_v43  ;;  %vm2949_vm8 = vmpackc.low %vm2214_vm3, %vm2213_vm15  ;;  %v2157_v23 = vadd.s32 72, %v3992_v38  ;;  %v2158_v37 = vadd.s32 80, %v3992_v38  ;;  %v2160_v48 = vadd.s32 96, %v3992_v38  ;;  %v2493_v49 = vld [vmem:[%s4428_s18 + $0x5] ss:$0 sm:$0xff] }
 0x992   :  { %v2106_v52 = vpop.permute.xlu0 %2105  ;;  %2067 = vrot.lane.b32.xlu0 %v3132_v45, %s3257_s2  ;;  %v2003_v4 = vsub.f32 %v1944_v62, %v4091_v2  ;;  %2950 = vmatpush1.bf16.msk.msra.mxu1 %vm2949_vm8, %v3271_v33  ;;  %vm2215_vm10 = vmand %vm2173_vm0, %vm2195_vm2  ;;  %vm2177_vm0 = vcmp.ge.s32.totalorder %v2154_v31, %v4105_v24  ;;  %vm2199_vm2 = vcmp.lt.s32.totalorder %v2154_v31, %v4110_v13  ;;  %v2161_v45 = vadd.s32 104, %v3992_v38 }
 0x993   :  { %v3134_v54 = vpop.eup %3133  ;;  %v2118_v58 = vmul.f32 %v2106_v52, %v2084_v47  ;;  %v2104_v60 = vpop.permute.xlu1 %2103  ;;  %2951 = vmatprep.subr.bf16.mxu1 %v3270_v21  ;;  %vm2216_vm12 = vmand %vm2174_vm4, %vm2196_vm5  ;;  %vm2178_vm5 = vcmp.ge.s32.totalorder %v2155_v42, %v4105_v24  ;;  %vm2200_vm8 = vcmp.lt.s32.totalorder %v2155_v42, %v4110_v13  ;;  %v2162_v47 = vadd.s32 112, %v3992_v38 }
 0x994   :  { %v2111_v61 = vsel %vm4436_vm9, %v2104_v60, %v2106_v52  ;;  %2065 = vrot.lane.b32.xlu1 %v3134_v54, %s3257_s2  ;;  %v2085_v56 = vmul.f32 %v2003_v4, %v2003_v4  ;;  %vm2952_vm15 = vmpackc.low %vm2216_vm12, %vm2215_vm10  ;;  %vm2201_vm12 = vcmp.lt.s32.totalorder %v2156_v34, %v4110_v13  ;;  %v2163_v52 = vadd.s32 120, %v3992_v38 }
 0x995   :  { %v2117_v1 = vmul.f32 %v2111_v61, %v2083_v57  ;;  %v3136_v6 = vpop.eup %3135  ;;  %vm4132_vm3 = vmand %vm2175_vm11, %vm2197_vm13  ;;  %vm2179_vm13 = vcmp.ge.s32.totalorder %v2156_v34, %v4105_v24  ;;  %v2164_v57 = vadd.s32 128, %v3992_v38  ;;  %v2166_v62 = vadd.s32 144, %v3992_v38 }
 0x996   :  { %2127 = vrot.lane.b32.xlu0 %v2118_v58, %s3257_s2  ;;  %v2110_v9 = vpop.permute.xlu0 %2109  ;;  %2953 = vmatpush1.bf16.msk.msra.mxu1 %vm2952_vm15, %v3271_v33  ;;  %vm2218_vm4 = vmand %vm2176_vm14, %vm2198_vm6  ;;  %vm2180_vm14 = vcmp.ge.s32.totalorder %v2157_v23, %v4105_v24  ;;  %vm2202_vm15 = vcmp.lt.s32.totalorder %v2157_v23, %v4110_v13  ;;  %v2165_v58 = vadd.s32 136, %v3992_v38  ;;  %v2007_v36 = vadd.f32 -1.0, %v4017_v63 }
 0x997   :  { %v2108_v5 = vpop.permute.xlu1 %2107  ;;  %v3138_v11 = vpop.eup %3137  ;;  %v2120_v16 = vmul.f32 %v2110_v9, %v2086_v10  ;;  %2954 = vmatprep.subr.bf16.mxu1 %v3270_v21  ;;  %vm2955_vm10 = vmpackc.low %vm2218_vm4, %vm4132_vm3  ;;  %vm2203_vm4 = vcmp.lt.s32.totalorder %v2158_v37, %v4110_v13  ;;  %v755_v54 = vadd.f32 %v2493_v49, %v3778_v25  ;;  %v1843_v60 = vmul.f32 %v3537_v53, %v3537_v53 }
 0x998   :  { %2125 = vrot.lane.b32.xlu1 %v2117_v1, %s3257_s2  ;;  %v2112_v15 = vsel %vm4436_vm9, %v2108_v5, %v2110_v9  ;;  %vm4146_vm11 = vmand %vm2177_vm0, %vm2199_vm2  ;;  %vm2181_vm2 = vcmp.ge.s32.totalorder %v2158_v37, %v4105_v24  ;;  %v2167_v1 = vadd.s32 152, %v3992_v38  ;;  %v1842_v61 = vmul.f32 %v3535_v50, %v3535_v50 }
 0x999   :  { %v2119_v17 = vmul.f32 %v2112_v15, %v2085_v56  ;;  %vm4153_vm6 = vmand %vm2178_vm5, %vm2200_vm8  ;;  %vm2182_vm8 = vcmp.ge.s32.totalorder %v2159_v40, %v4105_v24 }
 0x99a   :  { %2071 = vrot.lane.b32.xlu0 %v3136_v6, %s3257_s2  ;;  %2956 = vmatpush1.bf16.msk.msra.mxu1 %vm2955_vm10, %v3271_v33  ;;  %vm2958_vm3 = vmpackc.low %vm4153_vm6, %vm4146_vm11  ;;  %vm2204_vm10 = vcmp.lt.s32.totalorder %v2159_v40, %v4110_v13  ;;  %vm2183_vm6 = vcmp.ge.s32.totalorder %v2160_v48, %v4105_v24  ;;  %vm2212_vm1 = vcmp.lt.s32.totalorder %v2167_v1, %v4110_v13  ;;  %v2016_v38 = vpop.permute.xlu0 %2015  ;;  %v2005_v6 = vadd.f32 -1.0, %v4007_v55 }
 0x99b   :  { %2957 = vmatprep.subr.bf16.mxu1 %v3270_v21  ;;  %vm4165_vm0 = vmand %vm2179_vm13, %vm2201_vm12  ;;  %v2014_v3 = vpop.permute.xlu1 %2013 }
 0x99c   :  { %2069 = vrot.lane.b32.xlu1 %v3138_v11, %s3257_s2  ;;  %vm4171_vm5 = vmand %vm2180_vm14, %vm2202_vm15  ;;  %vm2205_vm14 = vcmp.lt.s32.totalorder %v2160_v48, %v4110_v13  ;;  %vm2184_vm15 = vcmp.ge.s32.totalorder %v2161_v45, %v4105_v24  ;;  %v2021_v10 = vsel %vm1928_vm7, %v2014_v3, %v2016_v38  ;;  %v2006_v11 = vadd.f32 -1.0, %v4005_v51 }
 0x99d   :  { %vm2961_vm11 = vmpackc.low %vm4171_vm5, %vm4165_vm0 }
 0x99e   :  { %2131 = vrot.lane.b32.xlu0 %v2120_v16, %s3257_s2  ;;  %2959 = vmatpush1.bf16.msk.msra.mxu1 %vm2958_vm3, %v3271_v33  ;;  %vm4184_vm13 = vmand %vm2181_vm2, %vm2203_vm4  ;;  %vm2206_vm3 = vcmp.lt.s32.totalorder %v2161_v45, %v4110_v13  ;;  %vm2185_vm2 = vcmp.ge.s32.totalorder %v2162_v47, %v4105_v24  ;;  %vm2207_vm4 = vcmp.lt.s32.totalorder %v2162_v47, %v4110_v13  ;;  %v2020_v4 = vpop.permute.xlu0 %2019 }
 0x99f   :  { %2960 = vmatprep.subr.bf16.mxu1 %v3270_v21  ;;  %vm4190_vm12 = vmand %vm2182_vm8, %vm2204_vm10  ;;  %vm2186_vm8 = vcmp.ge.s32.totalorder %v2163_v52, %v4105_v24  ;;  %vm2208_vm10 = vcmp.lt.s32.totalorder %v2163_v52, %v4110_v13  ;;  %v2018_v9 = vpop.permute.xlu1 %2017  ;;  %v2027_v16 = vsub.f32 %v2005_v6, %v2014_v3  ;;  %v758_v52 = vadd.f32 %v2493_v49, %v3780_v27 }
 0x9a0   :  { %2129 = vrot.lane.b32.xlu1 %v2119_v17, %s3257_s2  ;;  %vm2964_vm0 = vmpackc.low %vm4190_vm12, %vm4184_vm13  ;;  %v2028_v17 = vsub.f32 %v2006_v11, %v2021_v10  ;;  %v2022_v30 = vsel %vm1928_vm7, %v2018_v9, %v2020_v4  ;;  %v2029_v35 = vsub.f32 %v2007_v36, %v2018_v9 }
 0x9a1   :  { %vm4207_vm5 = vmand %vm2183_vm6, %vm2205_vm14  ;;  %vm2187_vm14 = vcmp.ge.s32.totalorder %v2164_v57, %v4105_v24 }
 0x9a2   :  { %2962 = vmatpush1.bf16.msk.msra.mxu1 %vm2961_vm11, %v3271_v33  ;;  %vm2226_vm11 = vmand %vm2184_vm15, %vm2206_vm3  ;;  %vm2209_vm15 = vcmp.lt.s32.totalorder %v2164_v57, %v4110_v13  ;;  %vm2188_vm3 = vcmp.ge.s32.totalorder %v2165_v58, %v4105_v24 }
 0x9a3   :  { %2963 = vmatprep.subr.bf16.mxu1 %v3270_v21  ;;  %vm4215_vm13 = vmand %vm2185_vm2, %vm2207_vm4  ;;  %vm2210_vm2 = vcmp.lt.s32.totalorder %v2165_v58, %v4110_v13 }
 0x9a4   :  { %vm4220_vm12 = vmand %vm2186_vm8, %vm2208_vm10  ;;  %vm2189_vm8 = vcmp.ge.s32.totalorder %v2166_v62, %v4105_v24  ;;  %vm2211_vm10 = vcmp.lt.s32.totalorder %v2166_v62, %v4110_v13 }
 0x9a5   :  { %vm2967_vm6 = vmpackc.low %vm2226_vm11, %vm4207_vm5  ;;  %vm2190_vm11 = vcmp.ge.s32.totalorder %v2167_v1, %v4105_v24 }
 0x9a6   :  { %2965 = vmatpush1.bf16.msk.msra.mxu1 %vm2964_vm0, %v3271_v33  ;;  %vm2970_vm0 = vmpackc.low %vm4220_vm12, %vm4215_vm13 }
 0x9a7   :  { %2966 = vmatprep.subr.bf16.mxu1 %v3270_v21  ;;  %vm2229_vm4 = vmand %vm2187_vm14, %vm2209_vm15 }
 0x9a8   :  { %vm2230_vm5 = vmand %vm2188_vm3, %vm2210_vm2  ;;  %vm4471_vm3 = vcmask 64512  }
 0x9a9   :  { %vm2973_vm9 = vmpackc.low %vm2230_vm5, %vm2229_vm4  ;;  %vm2432_vm4 = vcmask 752640   ;;  %vm2437_vm5 = vcmask 761568  }
 0x9aa   :  { %2968 = vmatpush1.bf16.msk.msra.mxu1 %vm2967_vm6, %v3271_v33  ;;  %vm2231_vm13 = vmand %vm2189_vm8, %vm2211_vm10  ;;  %vm2366_vm8 = vcmask 589184   ;;  %vm2377_vm10 = vcmask 671296  }
 0x9ab   :  { %2969 = vmatprep.subr.bf16.mxu1 %v3270_v21  ;;  %vm2232_vm12 = vmand %vm2190_vm11, %vm2212_vm1  ;;  %vm1058_vm1 = vcmask 80896   ;;  %vm2388_vm11 = vcmask 753296  }
 0x9ac   :  { %vm2976_vm6 = vmpackc.low %vm2232_vm12, %vm2231_vm13  ;;  %v1062_v57 = vsel %vm1058_vm1, %v758_v52, -inf  ;;  %v1059_v58 = vsel %vm1058_vm1, %v755_v54, -inf  ;;  %vm2399_vm13 = vcmask 1048288   ;;  %vm2440_vm12 = vcmask 769768  }
 0x9ad   :  { %vm4472_vm2 = vmmov %vm4471_vm3 }
 0x9ae   :  { %2971 = vmatpush1.bf16.msk.msra.mxu1 %vm2970_vm0, %v3271_v33  ;;  %vm2401_vm0 = vcmask 228352  }
 0x9af   :  { %2972 = vmatprep.subr.bf16.mxu1 %v3270_v21 }
 0x9b2   :  { %2974 = vmatpush1.bf16.msk.msra.mxu1 %vm2973_vm9, %v3271_v33  ;;  %vm4466_vm9 = vcmask 785408  }
 0x9b3   :  { %2975 = vmatprep.subr.bf16.mxu1 %v3270_v21  ;;  %vm4467_vm14 = vmmov %vm4466_vm9 }
 0x9b6   :  { %2977 = vmatpush1.bf16.msk.msra.mxu1 %vm2976_vm6, %v3271_v33  ;;  %v2008_v33 = vadd.f32 -1.0, %v4012_v59  ;;  %vm2443_vm6 = vcmask 777968  }
 0x9b8   :  { %v2030_v37 = vsub.f32 %v2008_v33, %v2022_v30 }
 0xa04   :  { %v2068_v5 = vpop.permute.xlu0 %2067 }
 0xa06   :  { %v2066_v15 = vpop.permute.xlu1 %2065 }
 0xa07   :  { %v2073_v56 = vsel %vm1928_vm7, %v2066_v15, %v2068_v5  ;;  %v2079_v21 = vadd.f32 %v2066_v15, %v2027_v16 }
 0xa08   :  { %v2128_v19 = vpop.permute.xlu0 %2127  ;;  %v2080_v22 = vadd.f32 %v2073_v56, %v2028_v17  ;;  %v1856_v56 = vmul.f32 1.442695, %v3537_v53  ;;  %v1854_v17 = vmul.f32 1.442695, %v3535_v50 }
 0xa0a   :  { %v2126_v24 = vpop.permute.xlu1 %2125 }
 0xa0b   :  { %v2133_v26 = vsel %vm1928_vm7, %v2126_v24, %v2128_v19  ;;  %v2139_v28 = vadd.f32 %v2126_v24, %v2079_v21 }
 0xa0c   :  { %v2140_v13 = vadd.f32 %v2133_v26, %v2080_v22  ;;  %v2072_v29 = vpop.permute.xlu0 %2071  ;;  %v1841_v26 = vadd.f32 1.0, %v3537_v53 }
 0xa0d   :  { %v2143_v31 = vmul.f32 0.5, %v2139_v28  ;;  %v1840_v28 = vadd.f32 1.0, %v3535_v50 }
 0xa0e   :  { %v2144_v42 = vmul.f32 0.5, %v2140_v13  ;;  %v2070_v34 = vpop.permute.xlu1 %2069 }
 0xa0f   :  { %v2074_v23 = vsel %vm1928_vm7, %v2070_v34, %v2072_v29  ;;  %2257 = vrot.lane.b32.xlu1 %v2143_v31, %s3265_s6  ;;  %v2081_v39 = vadd.f32 %v2070_v34, %v2029_v35  ;;  %v2536_v35 = vld [vmem:[%s4428_s18 + $0xb] ss:$0 sm:$0xff] }
 0xa10   :  { %2259 = vrot.lane.b32.xlu0 %v2144_v42, %s3265_s6  ;;  %v2082_v40 = vadd.f32 %v2074_v23, %v2030_v37  ;;  %v2132_v41 = vpop.permute.xlu0 %2131  ;;  %v1379_v53 = vadd.f32 %v2536_v35, %v3986_v20  ;;  %v1376_v50 = vadd.f32 %v2536_v35, %v3984_v18  ;;  %v3151_v23 = vld [vmem:[%s4443_s22 + $0x8] sm:$0xff] }
 0xa12   :  { %v2130_v43 = vpop.permute.xlu1 %2129  ;;  %v1820_v37 = vsub.f32 %v3151_v23, %v1379_v53 }
 0xa13   :  { %v2134_v44 = vsel %vm1928_vm7, %v2130_v43, %v2132_v41  ;;  %v2141_v48 = vadd.f32 %v2130_v43, %v2081_v39  ;;  %v2580_v39 = vld [vmem:[%s4468_s9] ss:$0 sm:$0xff] }
 0xa14   :  { %v2142_v45 = vadd.f32 %v2134_v44, %v2082_v40  ;;  %v3152_v40 = vld [vmem:[%s4443_s22] sm:$0xff]  ;;  %v1829_v43 = vmul.f32 %v2580_v39, %v1820_v37  ;;  %s3272_s22 = smov 28  }
 0xa15   :  { %v2145_v46 = vmul.f32 0.5, %v2141_v48  ;;  %v1819_v41 = vsub.f32 %v3152_v40, %v1376_v50 }
 0xa16   :  { %v2146_v47 = vmul.f32 0.5, %v2142_v45  ;;  %v1831_v44 = vmul.f32 %v1829_v43, %v1829_v43 }
 0xa17   :  { %2261 = vrot.lane.b32.xlu1 %v2145_v46, %s3265_s6  ;;  %v1828_v48 = vmul.f32 %v2580_v39, %v1819_v41 }
 0xa18   :  { %2263 = vrot.lane.b32.xlu0 %v2146_v47, %s3265_s6 }
 0xa19   :  { %v1830_v18 = vmul.f32 %v1828_v48, %v1828_v48 }
 0xa37   :  { %1063 = vmax.xlane.f32.xlu0 %v1062_v57 }
 0xa3b   :  { %1060 = vmax.xlane.f32.xlu1 %v1059_v58 }
 0xa4c   :  { %1848 = vrot.lane.b32.xlu1 %v1843_v60, %s3267_s29 }
 0xa4d   :  { %1846 = vrot.lane.b32.xlu0 %v1842_v61, %s3267_s29 }
 0xa81   :  { %v2258_v27 = vpop.permute.xlu1 %2257 }
 0xa82   :  { %v2260_v62 = vpop.permute.xlu0 %2259 }
 0xa83   :  { %v2265_v25 = vsel %vm4466_vm9, %v2258_v27, %v2260_v62  ;;  %2601 = vmatprep.mubr.msk.f32.mxu1 %vm1928_vm7, %v2260_v62  ;;  %vm2429_vm9 = vcmask 1047776  }
 0xa84   :  { %2338 = vmatmul.mubr.f32.vlgmr.msra.gmra.mrb[32].mxu1 %v2265_v25 }
 0xa89   :  { %v2262_v1 = vpop.permute.xlu1 %2261 }
 0xa8a   :  { %v2264_v38 = vpop.permute.xlu0 %2263 }
 0xa8b   :  { %2602 = vmatprep.mubr.msk.f32.mxu1 %vm1928_vm7, %v2264_v38  ;;  %v2266_v3 = vsel %vm4467_vm14, %v2262_v1, %v2264_v38  ;;  %vm4469_vm7 = vcmask 523264  }
 0xa8c   :  { %2343 = vmatmul.mubr.f32.gmra.mrb[34].mxu1 %v2266_v3  ;;  %v1835_v20 = vsel %vm4469_vm7, %v1831_v44, 0.0  ;;  %vm4470_vm15 = vmmov %vm4469_vm7 }
 0xa8d   :  { %v1832_v45 = vsel %vm4470_vm15, %v1830_v18, 0.0 }
 0xac4   :  { %v1064_v4 = vpop.xlane.xlu0 %1063 }
 0xac5   :  { %v1066_v9 = vsub.f32 %v758_v52, %v1064_v4 }
 0xac7   :  { %v1069_v5 = vmul.f32 1.442695, %v1066_v9 }
 0xac8   :  { %v1061_v6 = vpop.xlane.xlu1 %1060  ;;  %v1847_v24 = vpop.permute.xlu0 %1846 }
 0xac9   :  { %3139 = vpow2.f32 %v1069_v5  ;;  %v1065_v10 = vsub.f32 %v755_v54, %v1061_v6  ;;  %v1852_v29 = vsub.f32 %v1840_v28, %v1847_v24 }
 0xacb   :  { %v1067_v11 = vmul.f32 1.442695, %v1065_v10 }
 0xacc   :  { %v1849_v22 = vpop.permute.xlu1 %1848 }
 0xacd   :  { %3141 = vpow2.f32 %v1067_v11  ;;  %v1853_v13 = vsub.f32 %v1841_v26, %v1849_v22 }
 0xace   :  { %3143 = vpow2.f32 %v1856_v56 }
 0xacf   :  { %3145 = vpow2.f32 %v1854_v17 }
 0xad3   :  { %v3140_v15 = vpop.eup %3139 }
 0xad4   :  { %v1074_v16 = vsel %vm1058_vm1, %v3140_v15, 0.0 }
 0xad5   :  { %1075 = vadd.xlane.f32.xlu0 %v1074_v16 }
 0xad7   :  { %v3142_v19 = vpop.eup %3141 }
 0xad8   :  { %v1071_v21 = vsel %vm1058_vm1, %v3142_v19, 0.0  ;;  %v3144_v36 = vpop.eup %3143 }
 0xad9   :  { %1072 = vadd.xlane.f32.xlu1 %v1071_v21  ;;  %v3146_v30 = vpop.eup %3145  ;;  %v1859_v31 = vsub.f32 %v1853_v13, %v3144_v36 }
 0xada   :  { %v1858_v33 = vsub.f32 %v1852_v29, %v3146_v30 }
 0xadb   :  { %v1861_v42 = vmul.f32 -0.5, %v1859_v31 }
 0xadc   :  { %v1860_v34 = vmul.f32 -0.5, %v1858_v33 }
 0xaea   :  { %1866 = vrot.lane.b32.xlu1 %v1861_v42, %s3255_s17 }
 0xaeb   :  { %1864 = vrot.lane.b32.xlu0 %v1860_v34, %s3255_s17 }
 0xb0a   :  { %1836 = vadd.xlane.f32.xlu0 %v1835_v20 }
 0xb0e   :  { %1833 = vadd.xlane.f32.xlu1 %v1832_v45 }
 0xb57   :  { %v2339_v46 = vpop.f32.mrb[32].mxu1 }
 0xb58   :  { %v2341_v47 = vpop.f32.mrb[33].mxu1 }
 0xb5f   :  { %v2344_v49 = vpop.f32.mrb[34].mxu1 }
 0xb60   :  { %v2346_v52 = vpop.f32.mrb[35].mxu1 }
 0xb62   :  { %v1076_v54 = vpop.xlane.xlu0 %1075 }
 0xb66   :  { %v1073_v57 = vpop.xlane.xlu1 %1072  ;;  %v1865_v58 = vpop.permute.xlu0 %1864 }
 0xb67   :  { %v1870_v60 = vsel %vm4471_vm3, %v1865_v58, 0.0  ;;  %3147 = vrcp.f32 %v1073_v57 }
 0xb68   :  { %1871 = vadd.xlane.f32.xlu0 %v1870_v60  ;;  %3149 = vrcp.f32 %v1076_v54 }
 0xb6a   :  { %v1867_v61 = vpop.permute.xlu1 %1866 }
 0xb6b   :  { %v1873_v27 = vsel %vm4472_vm2, %v1867_v61, 0.0 }
 0xb6c   :  { %1874 = vadd.xlane.f32.xlu1 %v1873_v27 }
 0xb71   :  { %v3148_v62 = vpop.eup %3147 }
 0xb72   :  { %v3150_v25 = vpop.eup %3149  ;;  %v1079_v1 = vmul.f32 %v3148_v62, %v3142_v19 }
 0xb73   :  { %v1080_v38 = vmul.f32 %v3150_v25, %v3140_v15 }
 0xb74   :  { %v1081_v3 = vmul.f32 0.999999, %v1079_v1 }
 0xb75   :  { %v1082_v4 = vmul.f32 0.999999, %v1080_v38 }
 0xb77   :  { %v1084_v9 = vadd.f32 1e-07, %v1082_v4 }
 0xb79   :  { %v2349_v5 = vmul.f32 %v2344_v49, %v1084_v9 }
 0xb7b   :  { %v2353_v6 = vsel %vm1058_vm1, %v2349_v5, 0.0 }
 0xb7d   :  { %2411 = vrot.lane.b32.xlu1 %v4005_v51, %s3272_s22  ;;  %v1083_v51 = vadd.f32 1e-07, %v1081_v3 }
 0xb7e   :  { %2409 = vrot.lane.b32.xlu0 %v4007_v55, %s3272_s22  ;;  %v2515_v55 = vld [vmem:[%s4428_s18 + $0x8] ss:$0 sm:$0xff] }
 0xb81   :  { %2415 = vrot.lane.b32.xlu1 %v4017_v63, %s3272_s22  ;;  %v1055_v63 = vadd.f32 %v2515_v55, %v3861_v14 }
 0xb82   :  { %2417 = vrot.lane.b32.xlu0 %v4012_v59, %s3272_s22  ;;  %v1052_v59 = vadd.f32 %v2515_v55, %v3859_v12 }
 0xb85   :  { %2360 = vrot.lane.b32.xlu1 %v3584_v7, %s3259_s24  ;;  %v2348_v7 = vmul.f32 %v2339_v46, %v1083_v51 }
 0xb86   :  { %2362 = vrot.lane.b32.xlu0 %v3587_v8, %s3259_s24 }
 0xb87   :  { %v2350_v8 = vsel %vm1058_vm1, %v2348_v7, 0.0  ;;  %vm2446_vm1 = vcmask 1048312  }
 0xb89   :  { %2371 = vrot.lane.b32.xlu1 %v1083_v51, %s3263_s15 }
 0xb8a   :  { %2373 = vrot.lane.b32.xlu0 %v1084_v9, %s3263_s15 }
 0xb8d   :  { %2382 = vrot.lane.b32.xlu1 %v1052_v59, %s3273_s14 }
 0xb8e   :  { %2384 = vrot.lane.b32.xlu0 %v1055_v63, %s3273_s14 }
 0xb91   :  { %2393 = vrot.lane.b32.xlu1 %v1376_v50, %s3274_s27 }
 0xb92   :  { %2395 = vrot.lane.b32.xlu0 %v1379_v53, %s3274_s27 }
 0xb97   :  { %v1837_v12 = vpop.xlane.xlu0 %1836 }
 0xb98   :  { %v1839_v21 = vmul.f32 0.5, %v1837_v12 }
 0xb9b   :  { %v1834_v14 = vpop.xlane.xlu1 %1833 }
 0xb9c   :  { %v1838_v17 = vmul.f32 0.5, %v1834_v14 }
 0xbb1   :  { %2351 = vadd.xlane.f32.xlu0 %v2350_v8 }
 0xbb5   :  { %2354 = vadd.xlane.f32.xlu1 %v2353_v6 }
 0xbc6   :  { %2407 = vrot.lane.b32.xlu1 %v4075_v32, %s3272_s22 }
 0xbc7   :  { %2413 = vrot.lane.b32.xlu0 %v4091_v2, %s3272_s22 }
 0xbf5   :  { %v1872_v10 = vpop.xlane.xlu0 %1871 }
 0xbf9   :  { %v1875_v11 = vpop.xlane.xlu1 %1874  ;;  %v2410_v15 = vpop.permute.xlu0 %2409 }
 0xbfd   :  { %v2412_v16 = vpop.permute.xlu1 %2411  ;;  %v2418_v56 = vpop.permute.xlu0 %2417 }
 0xbfe   :  { %v2420_v19 = vsel %vm2401_vm0, %v2410_v15, %v2412_v16 }
 0xbff   :  { %2433 = vst.msk [vmem:[%s4429_s19 + $0x18] sm:$0xff] %vm2432_vm4, %v2420_v19 }
 0xc00   :  { %2438 = vst.msk [vmem:[%s4429_s19 + $0x18] sm:$0xff] %vm2437_vm5, %v1838_v17 }
 0xc01   :  { %v2416_v32 = vpop.permute.xlu1 %2415  ;;  %v2363_v2 = vpop.permute.xlu0 %2362 }
 0xc02   :  { %v2422_v22 = vsel %vm2401_vm0, %v2416_v32, %v2418_v56  ;;  %2368 = vst.msk [vmem:[%s4429_s19 + $0x20] sm:$0xff] %vm2366_vm8, %v2363_v2 }
 0xc03   :  { %2436 = vst.msk [vmem:[%s4429_s19 + $0x38] sm:$0xff] %vm2432_vm4, %v2422_v22 }
 0xc04   :  { %2439 = vst.msk [vmem:[%s4429_s19 + $0x38] sm:$0xff] %vm2437_vm5, %v1839_v21 }
 0xc05   :  { %v2361_v24 = vpop.permute.xlu1 %2360  ;;  %v2374_v26 = vpop.permute.xlu0 %2373 }
 0xc06   :  { %2367 = vst.msk [vmem:[%s4429_s19] sm:$0xff] %vm2366_vm8, %v2361_v24 }
 0xc07   :  { %2379 = vst.msk [vmem:[%s4429_s19 + $0x20] sm:$0xff] %vm2377_vm10, %v2374_v26 }
 0xc09   :  { %v2372_v28 = vpop.permute.xlu1 %2371  ;;  %v2385_v13 = vpop.permute.xlu0 %2384 }
 0xc0a   :  { %2378 = vst.msk [vmem:[%s4429_s19] sm:$0xff] %vm2377_vm10, %v2372_v28 }
 0xc0b   :  { %2390 = vst.msk [vmem:[%s4429_s19 + $0x20] sm:$0xff] %vm2388_vm11, %v2385_v13 }
 0xc0d   :  { %v2383_v29 = vpop.permute.xlu1 %2382  ;;  %v2396_v36 = vpop.permute.xlu0 %2395 }
 0xc0e   :  { %2389 = vst.msk [vmem:[%s4429_s19] sm:$0xff] %vm2388_vm11, %v2383_v29 }
 0xc0f   :  { %2403 = vst.msk [vmem:[%s4429_s19 + $0x20] sm:$0xff] %vm2399_vm13, %v2396_v36 }
 0xc10   :  { %2404 = vst.msk [vmem:[%s4429_s19 + $0x28] sm:$0xff] %vm2401_vm0, %v2396_v36 }
 0xc11   :  { %v2394_v30 = vpop.permute.xlu1 %2393 }
 0xc12   :  { %2400 = vst.msk [vmem:[%s4429_s19] sm:$0xff] %vm2399_vm13, %v2394_v30 }
 0xc13   :  { %2402 = vst.msk [vmem:[%s4429_s19 + $0x8] sm:$0xff] %vm2401_vm0, %v2394_v30 }
 0xc3e   :  { %v2352_v31 = vpop.xlane.xlu0 %2351 }
 0xc3f   :  { %2441 = vst.msk [vmem:[%s4429_s19 + $0x18] sm:$0xff] %vm2440_vm12, %v2352_v31 }
 0xc40   :  { %2444 = vst.msk [vmem:[%s4429_s19 + $0x18] sm:$0xff] %vm2443_vm6, %v1872_v10 }
 0xc41   :  { %2447 = vst.msk [vmem:[%s4429_s19 + $0x18] sm:$0xff] %vm2446_vm1, %v3253_v0 }
 0xc42   :  { %v2355_v33 = vpop.xlane.xlu1 %2354  ;;  %v2414_v42 = vpop.permute.xlu0 %2413 }
 0xc43   :  { %2442 = vst.msk [vmem:[%s4429_s19 + $0x38] sm:$0xff] %vm2440_vm12, %v2355_v33  ;;  %v2421_v34 = vsel %vm2401_vm0, %v2414_v42, %v2416_v32 }
 0xc44   :  { %2434 = vst.msk [vmem:[%s4429_s19 + $0x28] sm:$0xff] %vm2429_vm9, %v2414_v42  ;;  %2435 = vst [vmem:[%s4429_s19 + $0x30] sm:$0xff] %v2421_v34 }
 0xc45   :  { %2445 = vst.msk [vmem:[%s4429_s19 + $0x38] sm:$0xff] %vm2443_vm6, %v1875_v11 }
 0xc46   :  { %2448 = vst.msk [vmem:[%s4429_s19 + $0x38] sm:$0xff] %vm2446_vm1, %v3253_v0  ;;  %v2408_v35 = vpop.permute.xlu1 %2407 }
 0xc47   :  { %v2419_v53 = vsel %vm2401_vm0, %v2408_v35, %v2410_v15  ;;  %2430 = vst.msk [vmem:[%s4429_s19 + $0x8] sm:$0xff] %vm2429_vm9, %v2408_v35 }
 0xc48   :  { %2431 = vst [vmem:[%s4429_s19 + $0x10] sm:$0xff] %v2419_v53 }
 0xc49   :  { %2453 = vsyncpa [#allocation3], 1 }
 0xc4a   :  { %2454 = vsyncpa [#allocation5], 1 }
 0xc4b   :  { %2455 = vsyncpa [#allocation8], 1 }

</bundles_post_ra>
